<compile_context>
chip_gen: v7x
topology: tpu7x:2x2x1
jax: 0.10.0
libtpu: 0.0.40
codegen_flags: <defaults>
</compile_context>

<pallas_src>
import jax
import jax.numpy as jnp
from jax.experimental import pallas as pl
from jax.experimental.pallas import tpu as pltpu

EMB_DIM = 64               # e_net is built with n_classes=64 (embedding dim)
C8, C16, C32 = 32, 48, 64  # synthetic backbone channel widths


# -----------------------------------------------------------------------------
# Fused Pallas kernel: backbone conv + ReLU + score conv + upsample + 3-way add
# -----------------------------------------------------------------------------
def _fused_forward_kernel(
    x8_ref, x16_ref, x32_ref,
    w8_ref, b8_ref, sw8_ref, sb8_ref,
    w16_ref, b16_ref, sw16_ref, sb16_ref,
    w32_ref, b32_ref, sw32_ref, sb32_ref,
    u8_ref, u16_ref, u32_ref,
    out_ref,
    s8_sc, s16_sc, s32_sc,
):
    t = pl.program_id(1)   # pixel-tile index (inner, sequential per image)

    # The per-image scale scores are tiny: compute them once (on the first
    # pixel tile of each image) and keep them resident in VMEM scratch.
    @pl.when(t == 0)
    def _compute_scores():
        def scale_score(x_ref, w_ref, b_ref, sw_ref, sb_ref):
            x = x_ref[...]                       # (3, p)  pooled pixels, channel-major
            w = w_ref[...]                       # (C, 3)
            # cin == 3: three VPU broadcast FMAs instead of a K=3 MXU matmul.
            feat = (w[:, 0:1] * x[0:1, :]
                    + w[:, 1:2] * x[1:2, :]
                    + w[:, 2:3] * x[2:3, :]
                    + b_ref[...])                # (C, p)
            feat = jnp.maximum(feat, 0.0)        # ReLU
            # 1x1 score conv (C -> 64) on the MXU, bias folded in.
            return jnp.dot(sw_ref[...], feat,
                           preferred_element_type=jnp.float32) + sb_ref[...]

        s8_sc[...] = scale_score(x8_ref, w8_ref, b8_ref, sw8_ref, sb8_ref)
        s16_sc[...] = scale_score(x16_ref, w16_ref, b16_ref, sw16_ref, sb16_ref)
        s32_sc[...] = scale_score(x32_ref, w32_ref, b32_ref, sw32_ref, sb32_ref)

    # Bilinear upsample of all three scales + sum, fused into three small-K
    # matmuls producing the (64, TILE) channel-major output tile directly.
    acc = jnp.dot(s8_sc[...], u8_ref[...], preferred_element_type=jnp.float32)
    acc = acc + jnp.dot(s16_sc[...], u16_ref[...], preferred_element_type=jnp.float32)
    acc = acc + jnp.dot(s32_sc[...], u32_ref[...], preferred_element_type=jnp.float32)
    out_ref[...] = acc.astype(out_ref.dtype)


# -----------------------------------------------------------------------------
# Wrapper glue (pooling / interpolation-operator construction is shape-only)
# -----------------------------------------------------------------------------
def _avg_pool_nchw(x, k):
    n, c, h, w = x.shape
    return x.reshape(n, c, h // k, k, w // k, k).mean(axis=(3, 5))


def _interp_matrix(dst, src):
    # (dst, src) bilinear (half-pixel) interpolation weights = resize of identity.
    return jax.image.resize(jnp.eye(src, dtype=jnp.float32), (dst, src),
                            method="bilinear")


def _upsample_operator(hs, ws, h, w, rows):
    # Dense (rows, h*w) bilinear-upsample operator, zero-padded to `rows`
    # source pixels so the contraction dim is a multiple of 8.  Fine at these
    # resolutions; for very large images keep it separable instead.
    a = _interp_matrix(h, hs)                               # (h, hs)
    b = _interp_matrix(w, ws)                               # (w, ws)
    u = jnp.einsum("Yh,Xw->hwYX", a, b).reshape(hs * ws, h * w)
    return jnp.pad(u, ((0, rows - hs * ws), (0, 0)))


def _round_up8(v):
    return ((v + 7) // 8) * 8


def _pick_tile(hw):
    # Big lane-dense tiles (>=512 hits ~85% of HBM roofline); fall back to the
    # full pixel count for tiny images (block == full dim is always legal).
    for t in (1024, 512, 256, 128):
        if t <= hw and hw % t == 0:
            return t
    return hw


def two_heads_prm_forward(x_input_nchw, params):
    """Mirrors TwoHeads_PRM.forward: {'embedding_mask': (N,64,H,W), 'pointList': []}."""
    n, c, h, w = x_input_nchw.shape
    assert c == 3 and h % 32 == 0 and w % 32 == 0, "expects RGB with H, W divisible by 32"
    hw = h * w
    tile = _pick_tile(hw)

    # Pooled multi-scale inputs (backbone strides 8/16/32), channel-major,
    # spatially flattened, zero-padded to a sublane-friendly pixel count.
    pooled, ups, qs = [], [], []
    for s in (8, 16, 32):
        hs, ws = h // s, w // s
        p = hs * ws
        q = _round_up8(p)
        xp = _avg_pool_nchw(x_input_nchw, s).reshape(n, c, p)
        pooled.append(jnp.pad(xp, ((0, 0), (0, 0), (0, q - p))))
        ups.append(_upsample_operator(hs, ws, h, w, q))
        qs.append(q)
    q8, q16, q32 = qs

    def const_spec(shape):          # resident weights/biases (constant block index)
        return pl.BlockSpec(shape, lambda i, t: (0,) * len(shape))

    def pooled_spec(q):             # tiny per-image pooled inputs
        return pl.BlockSpec((None, 3, q), lambda i, t: (i, 0, 0))

    def ups_spec(q):                # upsample operator, tiled along output pixels
        return pl.BlockSpec((q, tile), lambda i, t: (0, t))

    in_specs = [
        pooled_spec(q8), pooled_spec(q16), pooled_spec(q32),
        const_spec((C8, 3)), const_spec((C8, 1)),
        const_spec((EMB_DIM, C8)), const_spec((EMB_DIM, 1)),
        const_spec((C16, 3)), const_spec((C16, 1)),
        const_spec((EMB_DIM, C16)), const_spec((EMB_DIM, 1)),
        const_spec((C32, 3)), const_spec((C32, 1)),
        const_spec((EMB_DIM, C32)), const_spec((EMB_DIM, 1)),
        ups_spec(q8), ups_spec(q16), ups_spec(q32),
    ]

    emb_flat = pl.pallas_call(
        _fused_forward_kernel,
        out_shape=jax.ShapeDtypeStruct((n, EMB_DIM, hw), jnp.float32),
        grid_spec=pltpu.PrefetchScalarGridSpec(
            num_scalar_prefetch=0,
            grid=(n, hw // tile),
            in_specs=in_specs,
            out_specs=pl.BlockSpec((None, EMB_DIM, tile), lambda i, t: (i, 0, t)),
            scratch_shapes=[
                pltpu.VMEM((EMB_DIM, q8), jnp.float32),
                pltpu.VMEM((EMB_DIM, q16), jnp.float32),
                pltpu.VMEM((EMB_DIM, q32), jnp.float32),
            ],
        ),
        compiler_params=pltpu.CompilerParams(
            # batch axis feeds both TensorCores on v7x; pixel-tile axis stays
            # in-order per image so the t==0 scratch init is valid.
            dimension_semantics=("parallel", "arbitrary"),
        ),
    )(
        pooled[0], pooled[1], pooled[2],
        params["w8"], params["b8"], params["sw8"], params["sb8"],
        params["w16"], params["b16"], params["sw16"], params["sb16"],
        params["w32"], params["b32"], params["sw32"], params["sb32"],
        ups[0], ups[1], ups[2],
    )

    embedding_mask = emb_flat.reshape(n, EMB_DIM, h, w)   # already channel-major / NCHW

    # TODO(synk): PRM.get_points + au.mask2pointList need the external pretrained
    # PRM checkpoint and connected-component post-processing; no Pallas equivalent.
    point_list = []
    return {"embedding_mask": embedding_mask, "pointList": point_list}


# -----------------------------------------------------------------------------
# Parameters and an unfused pure-JAX reference of the same synthetic forward
# -----------------------------------------------------------------------------
def init_params(key):
    ks = jax.random.split(key, 12)

    def lin(kw, kb, cin, cout):
        wt = jax.random.normal(kw, (cout, cin), jnp.float32) / jnp.sqrt(cin)
        b = 0.1 * jax.random.normal(kb, (cout, 1), jnp.float32)
        return wt, b

    p = {}
    p["w8"], p["b8"] = lin(ks[0], ks[1], 3, C8)
    p["w16"], p["b16"] = lin(ks[2], ks[3], 3, C16)
    p["w32"], p["b32"] = lin(ks[4], ks[5], 3, C32)
    p["sw8"], p["sb8"] = lin(ks[6], ks[7], C8, EMB_DIM)
    p["sw16"], p["sb16"] = lin(ks[8], ks[9], C16, EMB_DIM)
    p["sw32"], p["sb32"] = lin(ks[10], ks[11], C32, EMB_DIM)
    return p


def reference_forward(x_input_nchw, params):
    n, c, h, w = x_input_nchw.shape
    x = jnp.transpose(x_input_nchw, (0, 2, 3, 1))   # NHWC

    def path(stride, wt, b, swt, sb):
        hs, ws = h // stride, w // stride
        xp = x.reshape(n, hs, stride, ws, stride, c).mean(axis=(2, 4))
        feat = jax.nn.relu(jnp.einsum("nhwc,kc->nhwk", xp, wt) + b[:, 0])
        score = jnp.einsum("nhwk,ek->nhwe", feat, swt) + sb[:, 0]
        return jax.image.resize(score, (n, h, w, EMB_DIM), method="bilinear")

    emb = (path(8, params["w8"], params["b8"], params["sw8"], params["sb8"])
           + path(16, params["w16"], params["b16"], params["sw16"], params["sb16"])
           + path(32, params["w32"], params["b32"], params["sw32"], params["sb32"]))
    return jnp.transpose(emb, (0, 3, 1, 2))


# -----------------------------------------------------------------------------
if __name__ == "__main__":
    key = jax.random.PRNGKey(0)
    k_x, k_p = jax.random.split(key)

    # Small NCHW RGB input (H, W divisible by the stride-32 backbone).
    x_input = jax.random.normal(k_x, (2, 3, 32, 32), jnp.float32)
    params = init_params(k_p)

    forward = jax.jit(two_heads_prm_forward)
    out = forward(x_input, params)
    emb = out["embedding_mask"]
    jax.block_until_ready(emb)

    assert emb.shape == (2, EMB_DIM, 32, 32)
    assert emb.dtype == jnp.float32
    assert bool(jnp.all(jnp.isfinite(emb)))

    # Numerically check the fused kernel against the unfused pure-JAX forward.
    ref = reference_forward(x_input, params)
    max_err = float(jnp.max(jnp.abs(emb - ref)))
    ref_scale = float(jnp.max(jnp.abs(ref)))
    assert max_err <= 5e-2 * ref_scale + 1e-3, (max_err, ref_scale)

    print("KERNEL_OK")
</pallas_src>

<mosaic_0001>
module attributes {stable_mosaic.version = 11 : i64} {
  func.func @_fused_forward_kernel(%arg0: i32, %arg1: i32, %arg2: memref<1x3x16xf32, #tpu.memory_space<vmem>>, %arg3: memref<1x3x8xf32, #tpu.memory_space<vmem>>, %arg4: memref<1x3x8xf32, #tpu.memory_space<vmem>>, %arg5: memref<32x3xf32, #tpu.memory_space<vmem>>, %arg6: memref<32x1xf32, #tpu.memory_space<vmem>>, %arg7: memref<64x32xf32, #tpu.memory_space<vmem>>, %arg8: memref<64x1xf32, #tpu.memory_space<vmem>>, %arg9: memref<48x3xf32, #tpu.memory_space<vmem>>, %arg10: memref<48x1xf32, #tpu.memory_space<vmem>>, %arg11: memref<64x48xf32, #tpu.memory_space<vmem>>, %arg12: memref<64x1xf32, #tpu.memory_space<vmem>>, %arg13: memref<64x3xf32, #tpu.memory_space<vmem>>, %arg14: memref<64x1xf32, #tpu.memory_space<vmem>>, %arg15: memref<64x64xf32, #tpu.memory_space<vmem>>, %arg16: memref<64x1xf32, #tpu.memory_space<vmem>>, %arg17: memref<16x1024xf32, #tpu.memory_space<vmem>>, %arg18: memref<8x1024xf32, #tpu.memory_space<vmem>>, %arg19: memref<8x1024xf32, #tpu.memory_space<vmem>>, %arg20: memref<1x64x1024xf32, #tpu.memory_space<vmem>>, %arg21: memref<64x16xf32, #tpu.memory_space<vmem>>, %arg22: memref<64x8xf32, #tpu.memory_space<vmem>>, %arg23: memref<64x8xf32, #tpu.memory_space<vmem>>) attributes {dimension_semantics = [#tpu.dimension_semantics<parallel>, #tpu.dimension_semantics<arbitrary>], iteration_bounds = array<i64: 2, 1>, scalar_prefetch = 0 : i64, scratch_operands = 3 : i64, tpu.core_type = #tpu.core_type<tc>, window_params = [{transform_indices = @transform_0, window_bounds = array<i64: 1, 3, 16>}, {transform_indices = @transform_1, window_bounds = array<i64: 1, 3, 8>}, {transform_indices = @transform_2, window_bounds = array<i64: 1, 3, 8>}, {pipeline_mode = #tpu.pipeline_mode<synchronous>, transform_indices = @transform_3, window_bounds = array<i64: 32, 3>}, {pipeline_mode = #tpu.pipeline_mode<synchronous>, transform_indices = @transform_4, window_bounds = array<i64: 32, 1>}, {pipeline_mode = #tpu.pipeline_mode<synchronous>, transform_indices = @transform_5, window_bounds = array<i64: 64, 32>}, {pipeline_mode = #tpu.pipeline_mode<synchronous>, transform_indices = @transform_6, window_bounds = array<i64: 64, 1>}, {pipeline_mode = #tpu.pipeline_mode<synchronous>, transform_indices = @transform_7, window_bounds = array<i64: 48, 3>}, {pipeline_mode = #tpu.pipeline_mode<synchronous>, transform_indices = @transform_8, window_bounds = array<i64: 48, 1>}, {pipeline_mode = #tpu.pipeline_mode<synchronous>, transform_indices = @transform_9, window_bounds = array<i64: 64, 48>}, {pipeline_mode = #tpu.pipeline_mode<synchronous>, transform_indices = @transform_10, window_bounds = array<i64: 64, 1>}, {pipeline_mode = #tpu.pipeline_mode<synchronous>, transform_indices = @transform_11, window_bounds = array<i64: 64, 3>}, {pipeline_mode = #tpu.pipeline_mode<synchronous>, transform_indices = @transform_12, window_bounds = array<i64: 64, 1>}, {pipeline_mode = #tpu.pipeline_mode<synchronous>, transform_indices = @transform_13, window_bounds = array<i64: 64, 64>}, {pipeline_mode = #tpu.pipeline_mode<synchronous>, transform_indices = @transform_14, window_bounds = array<i64: 64, 1>}, {transform_indices = @transform_15, window_bounds = array<i64: 16, 1024>}, {transform_indices = @transform_16, window_bounds = array<i64: 8, 1024>}, {transform_indices = @transform_17, window_bounds = array<i64: 8, 1024>}, {transform_indices = @transform_18, window_bounds = array<i64: 1, 64, 1024>}]} {
    %c0_i32 = arith.constant 0 : i32
    %0 = arith.cmpi eq, %arg1, %c0_i32 : i32
    %1 = arith.extui %0 : i1 to i32
    %c0_i32_0 = arith.constant 0 : i32
    %2 = arith.cmpi ne, %1, %c0_i32_0 : i32
    scf.if %2 {
      %c0_17 = arith.constant 0 : index
      %c0_18 = arith.constant 0 : index
      %c0_19 = arith.constant 0 : index
      %17 = vector.load %arg2[%c0_17, %c0_18, %c0_19] : memref<1x3x16xf32, #tpu.memory_space<vmem>>, vector<1x3x16xf32>
      %18 = vector.shape_cast %17 : vector<1x3x16xf32> to vector<3x16xf32>
      %c0_20 = arith.constant 0 : index
      %c0_21 = arith.constant 0 : index
      %19 = vector.load %arg5[%c0_20, %c0_21] : memref<32x3xf32, #tpu.memory_space<vmem>>, vector<32x3xf32>
      %20 = vector.extract_strided_slice %19 {offsets = [0, 0], sizes = [32, 1], strides = [1, 1]} : vector<32x3xf32> to vector<32x1xf32>
      %21 = vector.extract_strided_slice %18 {offsets = [0, 0], sizes = [1, 16], strides = [1, 1]} : vector<3x16xf32> to vector<1x16xf32>
      %22 = vector.broadcast %20 : vector<32x1xf32> to vector<32x16xf32>
      %23 = vector.broadcast %21 : vector<1x16xf32> to vector<32x16xf32>
      %24 = arith.mulf %22, %23 : vector<32x16xf32>
      %25 = vector.extract_strided_slice %19 {offsets = [0, 1], sizes = [32, 1], strides = [1, 1]} : vector<32x3xf32> to vector<32x1xf32>
      %26 = vector.extract_strided_slice %18 {offsets = [1, 0], sizes = [1, 16], strides = [1, 1]} : vector<3x16xf32> to vector<1x16xf32>
      %27 = vector.broadcast %25 : vector<32x1xf32> to vector<32x16xf32>
      %28 = vector.broadcast %26 : vector<1x16xf32> to vector<32x16xf32>
      %29 = arith.mulf %27, %28 : vector<32x16xf32>
      %30 = arith.addf %24, %29 : vector<32x16xf32>
      %31 = vector.extract_strided_slice %19 {offsets = [0, 2], sizes = [32, 1], strides = [1, 1]} : vector<32x3xf32> to vector<32x1xf32>
      %32 = vector.extract_strided_slice %18 {offsets = [2, 0], sizes = [1, 16], strides = [1, 1]} : vector<3x16xf32> to vector<1x16xf32>
      %33 = vector.broadcast %31 : vector<32x1xf32> to vector<32x16xf32>
      %34 = vector.broadcast %32 : vector<1x16xf32> to vector<32x16xf32>
      %35 = arith.mulf %33, %34 : vector<32x16xf32>
      %36 = arith.addf %30, %35 : vector<32x16xf32>
      %c0_22 = arith.constant 0 : index
      %c0_23 = arith.constant 0 : index
      %37 = vector.load %arg6[%c0_22, %c0_23] : memref<32x1xf32, #tpu.memory_space<vmem>>, vector<32x1xf32>
      %38 = vector.broadcast %37 : vector<32x1xf32> to vector<32x16xf32>
      %39 = arith.addf %36, %38 : vector<32x16xf32>
      %cst_24 = arith.constant 0.000000e+00 : f32
      %40 = vector.broadcast %cst_24 : f32 to vector<32x16xf32>
      %41 = arith.maximumf %39, %40 : vector<32x16xf32>
      %c0_25 = arith.constant 0 : index
      %c0_26 = arith.constant 0 : index
      %42 = vector.load %arg7[%c0_25, %c0_26] : memref<64x32xf32, #tpu.memory_space<vmem>>, vector<64x32xf32>
      %cst_27 = arith.constant dense<0.000000e+00> : vector<64x16xf32>
      %43 = tpu.matmul %42, %41, %cst_27 {dimension_numbers = #tpu.dot_dimension_numbers<[1], [0], [0], [1], [0, 0, 1, 1], [], []>} : vector<64x32xf32>, vector<32x16xf32>, vector<64x16xf32> -> vector<64x16xf32>
      %c0_28 = arith.constant 0 : index
      %c0_29 = arith.constant 0 : index
      %44 = vector.load %arg8[%c0_28, %c0_29] : memref<64x1xf32, #tpu.memory_space<vmem>>, vector<64x1xf32>
      %45 = vector.broadcast %44 : vector<64x1xf32> to vector<64x16xf32>
      %46 = arith.addf %43, %45 : vector<64x16xf32>
      %c0_30 = arith.constant 0 : index
      %c0_31 = arith.constant 0 : index
      %47 = vector.load %arg21[%c0_30, %c0_31] : memref<64x16xf32, #tpu.memory_space<vmem>>, vector<64x16xf32>
      tpu.vector_store %arg21[%c0_30, %c0_31], %46 {strides = array<i32>} : memref<64x16xf32, #tpu.memory_space<vmem>>, vector<64x16xf32>,
      %c0_32 = arith.constant 0 : index
      %c0_33 = arith.constant 0 : index
      %c0_34 = arith.constant 0 : index
      %48 = vector.load %arg3[%c0_32, %c0_33, %c0_34] : memref<1x3x8xf32, #tpu.memory_space<vmem>>, vector<1x3x8xf32>
      %49 = vector.shape_cast %48 : vector<1x3x8xf32> to vector<3x8xf32>
      %c0_35 = arith.constant 0 : index
      %c0_36 = arith.constant 0 : index
      %50 = vector.load %arg9[%c0_35, %c0_36] : memref<48x3xf32, #tpu.memory_space<vmem>>, vector<48x3xf32>
      %51 = vector.extract_strided_slice %50 {offsets = [0, 0], sizes = [48, 1], strides = [1, 1]} : vector<48x3xf32> to vector<48x1xf32>
      %52 = vector.extract_strided_slice %49 {offsets = [0, 0], sizes = [1, 8], strides = [1, 1]} : vector<3x8xf32> to vector<1x8xf32>
      %53 = vector.broadcast %51 : vector<48x1xf32> to vector<48x8xf32>
      %54 = vector.broadcast %52 : vector<1x8xf32> to vector<48x8xf32>
      %55 = arith.mulf %53, %54 : vector<48x8xf32>
      %56 = vector.extract_strided_slice %50 {offsets = [0, 1], sizes = [48, 1], strides = [1, 1]} : vector<48x3xf32> to vector<48x1xf32>
      %57 = vector.extract_strided_slice %49 {offsets = [1, 0], sizes = [1, 8], strides = [1, 1]} : vector<3x8xf32> to vector<1x8xf32>
      %58 = vector.broadcast %56 : vector<48x1xf32> to vector<48x8xf32>
      %59 = vector.broadcast %57 : vector<1x8xf32> to vector<48x8xf32>
      %60 = arith.mulf %58, %59 : vector<48x8xf32>
      %61 = arith.addf %55, %60 : vector<48x8xf32>
      %62 = vector.extract_strided_slice %50 {offsets = [0, 2], sizes = [48, 1], strides = [1, 1]} : vector<48x3xf32> to vector<48x1xf32>
      %63 = vector.extract_strided_slice %49 {offsets = [2, 0], sizes = [1, 8], strides = [1, 1]} : vector<3x8xf32> to vector<1x8xf32>
      %64 = vector.broadcast %62 : vector<48x1xf32> to vector<48x8xf32>
      %65 = vector.broadcast %63 : vector<1x8xf32> to vector<48x8xf32>
      %66 = arith.mulf %64, %65 : vector<48x8xf32>
      %67 = arith.addf %61, %66 : vector<48x8xf32>
      %c0_37 = arith.constant 0 : index
      %c0_38 = arith.constant 0 : index
      %68 = vector.load %arg10[%c0_37, %c0_38] : memref<48x1xf32, #tpu.memory_space<vmem>>, vector<48x1xf32>
      %69 = vector.broadcast %68 : vector<48x1xf32> to vector<48x8xf32>
      %70 = arith.addf %67, %69 : vector<48x8xf32>
      %cst_39 = arith.constant 0.000000e+00 : f32
      %71 = vector.broadcast %cst_39 : f32 to vector<48x8xf32>
      %72 = arith.maximumf %70, %71 : vector<48x8xf32>
      %c0_40 = arith.constant 0 : index
      %c0_41 = arith.constant 0 : index
      %73 = vector.load %arg11[%c0_40, %c0_41] : memref<64x48xf32, #tpu.memory_space<vmem>>, vector<64x48xf32>
      %cst_42 = arith.constant dense<0.000000e+00> : vector<64x8xf32>
      %74 = tpu.matmul %73, %72, %cst_42 {dimension_numbers = #tpu.dot_dimension_numbers<[1], [0], [0], [1], [0, 0, 1, 1], [], []>} : vector<64x48xf32>, vector<48x8xf32>, vector<64x8xf32> -> vector<64x8xf32>
      %c0_43 = arith.constant 0 : index
      %c0_44 = arith.constant 0 : index
      %75 = vector.load %arg12[%c0_43, %c0_44] : memref<64x1xf32, #tpu.memory_space<vmem>>, vector<64x1xf32>
      %76 = vector.broadcast %75 : vector<64x1xf32> to vector<64x8xf32>
      %77 = arith.addf %74, %76 : vector<64x8xf32>
      %c0_45 = arith.constant 0 : index
      %c0_46 = arith.constant 0 : index
      %78 = vector.load %arg22[%c0_45, %c0_46] : memref<64x8xf32, #tpu.memory_space<vmem>>, vector<64x8xf32>
      tpu.vector_store %arg22[%c0_45, %c0_46], %77 {strides = array<i32>} : memref<64x8xf32, #tpu.memory_space<vmem>>, vector<64x8xf32>,
      %c0_47 = arith.constant 0 : index
      %c0_48 = arith.constant 0 : index
      %c0_49 = arith.constant 0 : index
      %79 = vector.load %arg4[%c0_47, %c0_48, %c0_49] : memref<1x3x8xf32, #tpu.memory_space<vmem>>, vector<1x3x8xf32>
      %80 = vector.shape_cast %79 : vector<1x3x8xf32> to vector<3x8xf32>
      %c0_50 = arith.constant 0 : index
      %c0_51 = arith.constant 0 : index
      %81 = vector.load %arg13[%c0_50, %c0_51] : memref<64x3xf32, #tpu.memory_space<vmem>>, vector<64x3xf32>
      %82 = vector.extract_strided_slice %81 {offsets = [0, 0], sizes = [64, 1], strides = [1, 1]} : vector<64x3xf32> to vector<64x1xf32>
      %83 = vector.extract_strided_slice %80 {offsets = [0, 0], sizes = [1, 8], strides = [1, 1]} : vector<3x8xf32> to vector<1x8xf32>
      %84 = vector.broadcast %82 : vector<64x1xf32> to vector<64x8xf32>
      %85 = vector.broadcast %83 : vector<1x8xf32> to vector<64x8xf32>
      %86 = arith.mulf %84, %85 : vector<64x8xf32>
      %87 = vector.extract_strided_slice %81 {offsets = [0, 1], sizes = [64, 1], strides = [1, 1]} : vector<64x3xf32> to vector<64x1xf32>
      %88 = vector.extract_strided_slice %80 {offsets = [1, 0], sizes = [1, 8], strides = [1, 1]} : vector<3x8xf32> to vector<1x8xf32>
      %89 = vector.broadcast %87 : vector<64x1xf32> to vector<64x8xf32>
      %90 = vector.broadcast %88 : vector<1x8xf32> to vector<64x8xf32>
      %91 = arith.mulf %89, %90 : vector<64x8xf32>
      %92 = arith.addf %86, %91 : vector<64x8xf32>
      %93 = vector.extract_strided_slice %81 {offsets = [0, 2], sizes = [64, 1], strides = [1, 1]} : vector<64x3xf32> to vector<64x1xf32>
      %94 = vector.extract_strided_slice %80 {offsets = [2, 0], sizes = [1, 8], strides = [1, 1]} : vector<3x8xf32> to vector<1x8xf32>
      %95 = vector.broadcast %93 : vector<64x1xf32> to vector<64x8xf32>
      %96 = vector.broadcast %94 : vector<1x8xf32> to vector<64x8xf32>
      %97 = arith.mulf %95, %96 : vector<64x8xf32>
      %98 = arith.addf %92, %97 : vector<64x8xf32>
      %c0_52 = arith.constant 0 : index
      %c0_53 = arith.constant 0 : index
      %99 = vector.load %arg14[%c0_52, %c0_53] : memref<64x1xf32, #tpu.memory_space<vmem>>, vector<64x1xf32>
      %100 = vector.broadcast %99 : vector<64x1xf32> to vector<64x8xf32>
      %101 = arith.addf %98, %100 : vector<64x8xf32>
      %cst_54 = arith.constant 0.000000e+00 : f32
      %102 = vector.broadcast %cst_54 : f32 to vector<64x8xf32>
      %103 = arith.maximumf %101, %102 : vector<64x8xf32>
      %c0_55 = arith.constant 0 : index
      %c0_56 = arith.constant 0 : index
      %104 = vector.load %arg15[%c0_55, %c0_56] : memref<64x64xf32, #tpu.memory_space<vmem>>, vector<64x64xf32>
      %cst_57 = arith.constant dense<0.000000e+00> : vector<64x8xf32>
      %105 = tpu.matmul %104, %103, %cst_57 {dimension_numbers = #tpu.dot_dimension_numbers<[1], [0], [0], [1], [0, 0, 1, 1], [], []>} : vector<64x64xf32>, vector<64x8xf32>, vector<64x8xf32> -> vector<64x8xf32>
      %c0_58 = arith.constant 0 : index
      %c0_59 = arith.constant 0 : index
      %106 = vector.load %arg16[%c0_58, %c0_59] : memref<64x1xf32, #tpu.memory_space<vmem>>, vector<64x1xf32>
      %107 = vector.broadcast %106 : vector<64x1xf32> to vector<64x8xf32>
      %108 = arith.addf %105, %107 : vector<64x8xf32>
      %c0_60 = arith.constant 0 : index
      %c0_61 = arith.constant 0 : index
      %109 = vector.load %arg23[%c0_60, %c0_61] : memref<64x8xf32, #tpu.memory_space<vmem>>, vector<64x8xf32>
      tpu.vector_store %arg23[%c0_60, %c0_61], %108 {strides = array<i32>} : memref<64x8xf32, #tpu.memory_space<vmem>>, vector<64x8xf32>,
    } else {
    }
    %c0 = arith.constant 0 : index
    %c0_1 = arith.constant 0 : index
    %3 = vector.load %arg21[%c0, %c0_1] : memref<64x16xf32, #tpu.memory_space<vmem>>, vector<64x16xf32>
    %c0_2 = arith.constant 0 : index
    %c0_3 = arith.constant 0 : index
    %4 = vector.load %arg17[%c0_2, %c0_3] : memref<16x1024xf32, #tpu.memory_space<vmem>>, vector<16x1024xf32>
    %cst = arith.constant dense<0.000000e+00> : vector<64x1024xf32>
    %5 = tpu.matmul %3, %4, %cst {dimension_numbers = #tpu.dot_dimension_numbers<[1], [0], [0], [1], [0, 0, 1, 1], [], []>} : vector<64x16xf32>, vector<16x1024xf32>, vector<64x1024xf32> -> vector<64x1024xf32>
    %c0_4 = arith.constant 0 : index
    %c0_5 = arith.constant 0 : index
    %6 = vector.load %arg22[%c0_4, %c0_5] : memref<64x8xf32, #tpu.memory_space<vmem>>, vector<64x8xf32>
    %c0_6 = arith.constant 0 : index
    %c0_7 = arith.constant 0 : index
    %7 = vector.load %arg18[%c0_6, %c0_7] : memref<8x1024xf32, #tpu.memory_space<vmem>>, vector<8x1024xf32>
    %cst_8 = arith.constant dense<0.000000e+00> : vector<64x1024xf32>
    %8 = tpu.matmul %6, %7, %cst_8 {dimension_numbers = #tpu.dot_dimension_numbers<[1], [0], [0], [1], [0, 0, 1, 1], [], []>} : vector<64x8xf32>, vector<8x1024xf32>, vector<64x1024xf32> -> vector<64x1024xf32>
    %9 = arith.addf %5, %8 : vector<64x1024xf32>
    %c0_9 = arith.constant 0 : index
    %c0_10 = arith.constant 0 : index
    %10 = vector.load %arg23[%c0_9, %c0_10] : memref<64x8xf32, #tpu.memory_space<vmem>>, vector<64x8xf32>
    %c0_11 = arith.constant 0 : index
    %c0_12 = arith.constant 0 : index
    %11 = vector.load %arg19[%c0_11, %c0_12] : memref<8x1024xf32, #tpu.memory_space<vmem>>, vector<8x1024xf32>
    %cst_13 = arith.constant dense<0.000000e+00> : vector<64x1024xf32>
    %12 = tpu.matmul %10, %11, %cst_13 {dimension_numbers = #tpu.dot_dimension_numbers<[1], [0], [0], [1], [0, 0, 1, 1], [], []>} : vector<64x8xf32>, vector<8x1024xf32>, vector<64x1024xf32> -> vector<64x1024xf32>
    %13 = arith.addf %9, %12 : vector<64x1024xf32>
    %c0_14 = arith.constant 0 : index
    %c0_15 = arith.constant 0 : index
    %c0_16 = arith.constant 0 : index
    %14 = vector.load %arg20[%c0_14, %c0_15, %c0_16] : memref<1x64x1024xf32, #tpu.memory_space<vmem>>, vector<1x64x1024xf32>
    %15 = vector.shape_cast %14 : vector<1x64x1024xf32> to vector<64x1024xf32>
    %16 = vector.shape_cast %13 : vector<64x1024xf32> to vector<1x64x1024xf32>
    tpu.vector_store %arg20[%c0_14, %c0_15, %c0_16], %16 {strides = array<i32>} : memref<1x64x1024xf32, #tpu.memory_space<vmem>>, vector<1x64x1024xf32>,
    return
  }
  func.func @transform_0(%arg0: i32, %arg1: i32) -> (i32, i32, i32) {
    %c0_i32 = arith.constant 0 : i32
    %c0_i32_0 = arith.constant 0 : i32
    %c0_i32_1 = arith.constant 0 : i32
    return %arg0, %c0_i32, %c0_i32_0 : i32, i32, i32
  }
  func.func @transform_1(%arg0: i32, %arg1: i32) -> (i32, i32, i32) {
    %c0_i32 = arith.constant 0 : i32
    %c0_i32_0 = arith.constant 0 : i32
    %c0_i32_1 = arith.constant 0 : i32
    return %arg0, %c0_i32, %c0_i32_0 : i32, i32, i32
  }
  func.func @transform_2(%arg0: i32, %arg1: i32) -> (i32, i32, i32) {
    %c0_i32 = arith.constant 0 : i32
    %c0_i32_0 = arith.constant 0 : i32
    %c0_i32_1 = arith.constant 0 : i32
    return %arg0, %c0_i32, %c0_i32_0 : i32, i32, i32
  }
  func.func @transform_3(%arg0: i32, %arg1: i32) -> (i32, i32) {
    %c0_i32 = arith.constant 0 : i32
    %c0_i32_0 = arith.constant 0 : i32
    %c0_i32_1 = arith.constant 0 : i32
    return %c0_i32, %c0_i32_0 : i32, i32
  }
  func.func @transform_4(%arg0: i32, %arg1: i32) -> (i32, i32) {
    %c0_i32 = arith.constant 0 : i32
    %c0_i32_0 = arith.constant 0 : i32
    %c0_i32_1 = arith.constant 0 : i32
    return %c0_i32, %c0_i32_0 : i32, i32
  }
  func.func @transform_5(%arg0: i32, %arg1: i32) -> (i32, i32) {
    %c0_i32 = arith.constant 0 : i32
    %c0_i32_0 = arith.constant 0 : i32
    %c0_i32_1 = arith.constant 0 : i32
    return %c0_i32, %c0_i32_0 : i32, i32
  }
  func.func @transform_6(%arg0: i32, %arg1: i32) -> (i32, i32) {
    %c0_i32 = arith.constant 0 : i32
    %c0_i32_0 = arith.constant 0 : i32
    %c0_i32_1 = arith.constant 0 : i32
    return %c0_i32, %c0_i32_0 : i32, i32
  }
  func.func @transform_7(%arg0: i32, %arg1: i32) -> (i32, i32) {
    %c0_i32 = arith.constant 0 : i32
    %c0_i32_0 = arith.constant 0 : i32
    %c0_i32_1 = arith.constant 0 : i32
    return %c0_i32, %c0_i32_0 : i32, i32
  }
  func.func @transform_8(%arg0: i32, %arg1: i32) -> (i32, i32) {
    %c0_i32 = arith.constant 0 : i32
    %c0_i32_0 = arith.constant 0 : i32
    %c0_i32_1 = arith.constant 0 : i32
    return %c0_i32, %c0_i32_0 : i32, i32
  }
  func.func @transform_9(%arg0: i32, %arg1: i32) -> (i32, i32) {
    %c0_i32 = arith.constant 0 : i32
    %c0_i32_0 = arith.constant 0 : i32
    %c0_i32_1 = arith.constant 0 : i32
    return %c0_i32, %c0_i32_0 : i32, i32
  }
  func.func @transform_10(%arg0: i32, %arg1: i32) -> (i32, i32) {
    %c0_i32 = arith.constant 0 : i32
    %c0_i32_0 = arith.constant 0 : i32
    %c0_i32_1 = arith.constant 0 : i32
    return %c0_i32, %c0_i32_0 : i32, i32
  }
  func.func @transform_11(%arg0: i32, %arg1: i32) -> (i32, i32) {
    %c0_i32 = arith.constant 0 : i32
    %c0_i32_0 = arith.constant 0 : i32
    %c0_i32_1 = arith.constant 0 : i32
    return %c0_i32, %c0_i32_0 : i32, i32
  }
  func.func @transform_12(%arg0: i32, %arg1: i32) -> (i32, i32) {
    %c0_i32 = arith.constant 0 : i32
    %c0_i32_0 = arith.constant 0 : i32
    %c0_i32_1 = arith.constant 0 : i32
    return %c0_i32, %c0_i32_0 : i32, i32
  }
  func.func @transform_13(%arg0: i32, %arg1: i32) -> (i32, i32) {
    %c0_i32 = arith.constant 0 : i32
    %c0_i32_0 = arith.constant 0 : i32
    %c0_i32_1 = arith.constant 0 : i32
    return %c0_i32, %c0_i32_0 : i32, i32
  }
  func.func @transform_14(%arg0: i32, %arg1: i32) -> (i32, i32) {
    %c0_i32 = arith.constant 0 : i32
    %c0_i32_0 = arith.constant 0 : i32
    %c0_i32_1 = arith.constant 0 : i32
    return %c0_i32, %c0_i32_0 : i32, i32
  }
  func.func @transform_15(%arg0: i32, %arg1: i32) -> (i32, i32) {
    %c0_i32 = arith.constant 0 : i32
    %c0_i32_0 = arith.constant 0 : i32
    return %c0_i32, %arg1 : i32, i32
  }
  func.func @transform_16(%arg0: i32, %arg1: i32) -> (i32, i32) {
    %c0_i32 = arith.constant 0 : i32
    %c0_i32_0 = arith.constant 0 : i32
    return %c0_i32, %arg1 : i32, i32
  }
  func.func @transform_17(%arg0: i32, %arg1: i32) -> (i32, i32) {
    %c0_i32 = arith.constant 0 : i32
    %c0_i32_0 = arith.constant 0 : i32
    return %c0_i32, %arg1 : i32, i32
  }
  func.func @transform_18(%arg0: i32, %arg1: i32) -> (i32, i32, i32) {
    %c0_i32 = arith.constant 0 : i32
    %c0_i32_0 = arith.constant 0 : i32
    return %arg0, %c0_i32, %arg1 : i32, i32, i32
  }
}

</mosaic_0001>

<bundles_post_ra>
// kernel: two_heads_prm_forward.1
= control target key start
LH: loop header
LB: loop body
LE: loop exit
PB: predicated region body
PF: predicated region fallthrough
CT: control target
= control target key end

     0   :  { %s4197_s27 = smov 0   ;;  %s4199_s28 = smov 0   ;;  %s5148_s0 = inlined_call_operand.vmem [shape: f32[2,3,16], index: 0, kind: input, shape index: {}]   ;;  %s5149_s1 = inlined_call_operand.vmem [shape: f32[2,3,8], index: 1, kind: input, shape index: {}]   ;;  %s5150_s2 = inlined_call_operand.vmem [shape: f32[2,3,8], index: 2, kind: input, shape index: {}]   ;;  %s5151_s3 = inlined_call_operand.vmem [shape: f32[32,3], index: 3, kind: input, shape index: {}]   ;;  %s5152_s4 = inlined_call_operand.vmem [shape: f32[32,1], index: 4, kind: input, shape index: {}]   ;;  %s5153_s5 = inlined_call_operand.vmem [shape: f32[64,32], index: 5, kind: input, shape index: {}]   ;;  %s5154_s6 = inlined_call_operand.vmem [shape: f32[64,1], index: 6, kind: input, shape index: {}]   ;;  %s5155_s7 = inlined_call_operand.vmem [shape: f32[48,3], index: 7, kind: input, shape index: {}]   ;;  %s5156_s8 = inlined_call_operand.vmem [shape: f32[48,1], index: 8, kind: input, shape index: {}]   ;;  %s5157_s9 = inlined_call_operand.vmem [shape: f32[64,48], index: 9, kind: input, shape index: {}]   ;;  %s5158_s10 = inlined_call_operand.vmem [shape: f32[64,1], index: 10, kind: input, shape index: {}]   ;;  %s5159_s11 = inlined_call_operand.vmem [shape: f32[64,3], index: 11, kind: input, shape index: {}]   ;;  %s5160_s12 = inlined_call_operand.vmem [shape: f32[64,1], index: 12, kind: input, shape index: {}]   ;;  %s5161_s13 = inlined_call_operand.vmem [shape: f32[64,64], index: 13, kind: input, shape index: {}]   ;;  %s5162_s14 = inlined_call_operand.vmem [shape: f32[64,1], index: 14, kind: input, shape index: {}]   ;;  %s5163_s15 = inlined_call_operand.vmem [shape: f32[16,1024], index: 15, kind: input, shape index: {}]   ;;  %s5164_s16 = inlined_call_operand.vmem [shape: f32[8,1024], index: 16, kind: input, shape index: {}]   ;;  %s5165_s17 = inlined_call_operand.vmem [shape: f32[8,1024], index: 17, kind: input, shape index: {}]   ;;  %s5166_s18 = inlined_call_operand.vmem [shape: f32[2,64,1024], index: 18, kind: output, shape index: {}]  }
   0x1   :  { %5167 = sst [smem:[#allocation5_spill]] %s5148_s0  ;;  %s4201_s29 = smov 0  }
   0x2   :  { %5168 = sst [smem:[#allocation6_spill]] %s5149_s1 }
   0x3   :  { %5169 = sst [smem:[#allocation7_spill]] %s5150_s2 }
   0x4 LB: > { %s40_s30 = sadd.s32 1, %s4092_s28  ;;  %p3580_p0 = scmp.ge.s32.totalorder %s4096_s29, 1  ;;  %s4096_s29 = sphi %s4201_s29, %s28_s29   ;;  %s4092_s28 = sphi %s4199_s28, %s5174_s28   ;;  %s4088_s27 = sphi %s4197_s27, %s5173_s27  }
   0x5   : > { %p42_p1 = scmp.ge.s32.totalorder %s40_s30, 2  ;;  %p576_p2 = scmp.lt.s32.totalorder %s4096_s29, 3 }
   0x7   : > { %s5176_s30 = smov (%p42_p1, %s40_s30), 0  ;;  %p577_p3 = pnand %p3580_p0, %p576_p2 }
   0x8   : > { %v1017_v0 = vld [vmem:[%s5155_s7] sm:$0xff] (!%p577_p3)  ;;  %v4098_v1 = vmov (!%p577_p3), 1   ;;  %v4099_v2 = vmov (!%p577_p3), 0   ;;  %p656_p4 = scmp.lt.s32.totalorder (!%p577_p3), %s4088_s27, 1  ;;  %v725_v3 = vlaneseq (!%p577_p3)  ;;  %v1018_v4 = vld [vmem:[%s5155_s7 + $0x8] sm:$0xff] (!%p577_p3)  ;;  %v1020_v6 = vld [vmem:[%s5155_s7 + $0x18] sm:$0xff] (!%p577_p3) }
   0x9   : > { %580 = sbr.rel (%p577_p3) target bundleno = 847 (0x34f), region = 92  ;;  %4040 = vset.pattern.permute.xlu1 (!%p577_p3), %v4098_v1  ;;  %4039 = vset.pattern.permute.xlu0 (!%p577_p3), %v4099_v2  ;;  %s5170_s25 = sld [smem:[#allocation7_spill]] (!%p577_p3)  ;;  %v4100_v9 = vmov (!%p577_p3), 2   ;;  %v1144_v11 = vld [vmem:[%s5156_s8 + $0x8] sm:$0xff] (!%p577_p3)  ;;  %v1019_v14 = vld [vmem:[%s5155_s7 + $0x10] sm:$0xff] (!%p577_p3)  ;;  %v1021_v15 = vld [vmem:[%s5155_s7 + $0x20] sm:$0xff] (!%p577_p3) }
   0xa   : > { %1064 = vperm.xlu1 (!%p577_p3), %4040, %v1017_v0   ;;  %1025 = vperm.xlu0 (!%p577_p3), %4039, %v1017_v0   ;;  %v4225_v5 = vshrl.u32 (!%p577_p3), %v725_v3, 7  ;;  %v1022_v16 = vld [vmem:[%s5155_s7 + $0x28] sm:$0xff] (!%p577_p3)  ;;  %v1143_v17 = vld [vmem:[%s5156_s8] sm:$0xff] (!%p577_p3)  ;;  %v704_v20 = vld [vmem:[%s5151_s3 + $0x18] sm:$0xff] (!%p577_p3)  ;;  %vm1247_vm0 = vcmask (!%p577_p3), 392192   ;;  %vm877_vm1 = vcmask (!%p577_p3), 261120  }
   0xb   : > { %v1147_v18 = vld [vmem:[%s5156_s8 + $0x20] sm:$0xff] (!%p577_p3)  ;;  %v702_v19 = vld [vmem:[%s5151_s3 + $0x8] sm:$0xff] (!%p577_p3)  ;;  %v703_v21 = vld [vmem:[%s5151_s3 + $0x10] sm:$0xff] (!%p577_p3)  ;;  %s5172_s0 = sld [smem:[#allocation6_spill]] (!%p577_p3)  ;;  %vm1671_vm2 = vcmask (!%p577_p3), 523264   ;;  %vm1377_vm3 = vcmask (!%p577_p3), 64512  }
   0xc   : > { %v4238_v7 = vsub.s32 (!%p577_p3), 1, %v4225_v5  ;;  %v4241_v8 = vsub.s32 (!%p577_p3), 0, %v4225_v5  ;;  %v1145_v22 = vld [vmem:[%s5156_s8 + $0x10] sm:$0xff] (!%p577_p3)  ;;  %v789_v23 = vld [vmem:[%s5152_s4] sm:$0xff] (!%p577_p3)  ;;  %v1146_v24 = vld [vmem:[%s5156_s8 + $0x18] sm:$0xff] (!%p577_p3)  ;;  %v4436_v61 = vsub.s32 (!%p577_p3), 2, %v4225_v5 }
   0xd   : > { %v792_v25 = vld [vmem:[%s5152_s4 + $0x18] sm:$0xff] (!%p577_p3)  ;;  %v1148_v28 = vld [vmem:[%s5156_s8 + $0x28] sm:$0xff] (!%p577_p3)  ;;  %v701_v30 = vld [vmem:[%s5151_s3] sm:$0xff] (!%p577_p3)  ;;  %vm1007_vm4 = vcmask (!%p577_p3), 130048  }
   0xe   : > { %1068 = vperm.xlu1 (!%p577_p3), %4040, %v1018_v4   ;;  %1030 = vperm.xlu0 (!%p577_p3), %4039, %v1018_v4   ;;  %v4321_v29 = vld [vmem:[%s5159_s11 + $0x8] sm:$0xff] (!%p577_p3)  ;;  %v4335_v32 = vld [vmem:[%s5159_s11 + $0x18] sm:$0xff] (!%p577_p3)  ;;  %v1191_v34 = vld [vmem:[%s5157_s9] sm:$0xff] (!%p577_p3) }
   0xf   : > { %v4341_v33 = vld [vmem:[%s5159_s11 + $0x28] sm:$0xff] (!%p577_p3)  ;;  %3783 = vmatprep.mubr.msk.f32.mxu1 (!%p577_p3), %vm1247_vm0, %v1191_v34  ;;  %v4352_v35 = vld [vmem:[%s5159_s11 + $0x38] sm:$0xff] (!%p577_p3)  ;;  %v4361_v36 = vld [vmem:[%s5159_s11 + $0x10] sm:$0xff] (!%p577_p3) }
  0x10   : > { %s5178_s27 = smov (!%p656_p4, %s4088_s27), 1  ;;  %v1551_v37 = vld [vmem:[%s5160_s12] sm:$0xff]  ;;  %v1553_v38 = vld [vmem:[%s5160_s12 + $0x10] sm:$0xff]  ;;  %v790_v39 = vld [vmem:[%s5152_s4 + $0x8] sm:$0xff] }
  0x11   : > { %s4228_s21 = sshll.u32 %s5178_s27, 2  ;;  %v1555_v40 = vld [vmem:[%s5160_s12 + $0x20] sm:$0xff]  ;;  %v791_v41 = vld [vmem:[%s5152_s4 + $0x10] sm:$0xff]  ;;  %v1558_v42 = vld [vmem:[%s5160_s12 + $0x38] sm:$0xff] }
  0x12   : > { %s667_s26 = scalar_lea.vmem %s5170_s25, %s4228_s21  ;;  %4041 = vset.pattern.permute.xlu1 %v4100_v9  ;;  %1040 = vperm.xlu0 %4039, %v1020_v6   ;;  %s5171_s25 = sld [smem:[#allocation5_spill]]  ;;  %v1387_v43 = vld [vmem:[%s5159_s11] sm:$0xff]  ;;  %v1200_v44 = vld [vmem:[%s5158_s10 + $0x8] sm:$0xff]  ;;  %v1202_v45 = vld [vmem:[%s5158_s10 + $0x18] sm:$0xff] }
  0x13   : > { %v4244_v10 = vld [vmem:[%s667_s26] sm:$0x7]  ;;  %1108 = vperm.xlu1 %4041, %v1018_v4   ;;  %v1204_v47 = vld [vmem:[%s5158_s10 + $0x28] sm:$0xff]  ;;  %v1206_v48 = vld [vmem:[%s5158_s10 + $0x38] sm:$0xff]  ;;  %s663_s19 = scalar_lea.vmem %s5172_s0, %s4228_s21  ;;  %s3708_s0 = sshll.u32 %s5178_s27, 9 }
  0x14   : > { %v4251_v12 = vrot.slane %v4244_v10, %v4238_v7  ;;  %v4255_v13 = vrot.slane %v4244_v10, %v4241_v8  ;;  %v821_v46 = vld [vmem:[%s5153_s5] sm:$0xff]  ;;  %v830_v51 = vld [vmem:[%s5154_s6 + $0x8] sm:$0xff]  ;;  %v832_v54 = vld [vmem:[%s5154_s6 + $0x18] sm:$0xff]  ;;  %s5073_s20 = scalar_lea.vmem %s5166_s18, %s3708_s0 }
  0x15   : > { %3759 = vmatprep.mubr.msk.f32.mxu0 %vm877_vm1, %v821_v46  ;;  %v834_v57 = vld [vmem:[%s5154_s6 + $0x28] sm:$0xff]  ;;  %v836_v59 = vld [vmem:[%s5154_s6 + $0x38] sm:$0xff]  ;;  %v1016_v62 = vld [vmem:[%s663_s19] sm:$0x7] }
  0x16   : > { %1156 = vperm.xlu0 %4039, %v1144_v11   ;;  %v4445_v4 = vrot.slane %v1016_v62, %v4238_v7  ;;  %v4451_v5 = vrot.slane %v1016_v62, %v4436_v61  ;;  %v1626_v11 = vld [vmem:[%s5162_s14 + $0x18] sm:$0xff] }
  0x17   : > { %4042 = vset.pattern.permute.xlu1 %v4099_v2 }
  0x18   : > { %1035 = vperm.xlu1 %4042, %v1019_v14   ;;  %s659_s26 = scalar_lea.vmem %s5171_s25, %s4228_s21 }
  0x19   : > { %v4309_v26 = vld [vmem:[%s659_s26] sm:$0x7] }
  0x1a   : > { %4046 = vset.pattern.permute.xlu0 %v4098_v1  ;;  %v4313_v27 = vrot.slane %v4309_v26, %v4238_v7  ;;  %v4330_v31 = vrot.slane %v4309_v26, %v4241_v8  ;;  %v1552_v7 = vld [vmem:[%s5160_s12 + $0x8] sm:$0xff] }
  0x1b   : > { %1080 = vperm.xlu0 %4046, %v1021_v15  }
  0x1c   : > { %4043 = vset.pattern.permute.xlu1 %v4098_v1 }
  0x1d   : > { %1072 = vperm.xlu1 %4043, %v1019_v14  }
  0x1f   : > { %4047 = vset.pattern.permute.xlu0 %v4100_v9 }
  0x20   : > { %1104 = vperm.xlu0 %4047, %v1017_v0   ;;  %v1624_v0 = vld [vmem:[%s5162_s14 + $0x8] sm:$0xff] }
  0x21   : > { %1076 = vperm.xlu1 %4043, %v1020_v6  }
  0x24   : > { %1112 = vperm.xlu0 %4047, %v1019_v14  }
  0x25   : > { %4044 = vset.pattern.permute.xlu1 %v4100_v9 }
  0x26   : > { %1116 = vperm.xlu1 %4044, %v1020_v6   ;;  %v4448_v6 = vrot.slane %v1016_v62, %v4241_v8 }
  0x28   : > { %1124 = vperm.xlu0 %4047, %v1022_v16  }
  0x2a   : > { %4045 = vset.pattern.permute.xlu1 %v4099_v2 }
  0x2b   : > { %1151 = vperm.xlu1 %4045, %v1143_v17  }
  0x2c   : > { %4051 = vset.pattern.permute.xlu0 %v4099_v2 }
  0x2d   : > { %1171 = vperm.xlu0 %4051, %v1147_v18   ;;  %v1628_v18 = vld [vmem:[%s5162_s14 + $0x28] sm:$0xff] }
  0x2f   : > { %1045 = vperm.xlu1 %4045, %v1021_v15  }
  0x31   : > { %4053 = vset.pattern.permute.xlu0 %v4098_v1 }
  0x32   : > { %738 = vperm.xlu0 %4053, %v702_v19  }
  0x33   : > { %1050 = vperm.xlu1 %4045, %v1022_v16  }
  0x36   : > { %746 = vperm.xlu0 %4053, %v704_v20  }
  0x37   : > { %4048 = vset.pattern.permute.xlu1 %v4098_v1 }
  0x38   : > { %1084 = vperm.xlu1 %4048, %v1022_v16  }
  0x3a   : > { %4057 = vset.pattern.permute.xlu0 %v4099_v2 }
  0x3b   : > { %712 = vperm.xlu0 %4057, %v702_v19  }
  0x3c   : > { %4049 = vset.pattern.permute.xlu1 %v4100_v9 }
  0x3d   : > { %1120 = vperm.xlu1 %4049, %v1021_v15  }
  0x3f   : > { %717 = vperm.xlu0 %4057, %v703_v21  }
  0x41   : > { %4050 = vset.pattern.permute.xlu1 %v4099_v2 }
  0x42   : > { %1161 = vperm.xlu1 %4050, %v1145_v22   ;;  %v1391_v22 = vld [vmem:[%s5159_s11 + $0x20] sm:$0xff] }
  0x43   : > { %795 = vperm.xlu0 %4057, %v789_v23  }
  0x46   : > { %1166 = vperm.xlu1 %4050, %v1146_v24  }
  0x47   : > { %810 = vperm.xlu0 %4057, %v792_v25  }
  0x4a   : > { %1176 = vperm.xlu1 %4050, %v1148_v28  }
  0x4b   : > { %4061 = vset.pattern.permute.xlu0 %v4098_v1 }
  0x4c   : > { %1452 = vperm.xlu0 %4061, %v4321_v29  }
  0x4e   : > { %707 = vperm.xlu1 %4050, %v701_v30  }
  0x50   : > { %1460 = vperm.xlu0 %4061, %v4335_v32  }
  0x52   : > { %4052 = vset.pattern.permute.xlu1 %v4098_v1 }
  0x53   : > { %734 = vperm.xlu1 %4052, %v701_v30  }
  0x54   : > { %1468 = vperm.xlu0 %4061, %v4341_v33  }
  0x57   : > { %4054 = vset.pattern.permute.xlu1 %v4100_v9 }
  0x58   : > { %762 = vperm.xlu1 %4054, %v701_v30   ;;  %1476 = vperm.xlu0 %4061, %v4352_v35  }
  0x5c   : > { %766 = vperm.xlu1 %4054, %v702_v19   ;;  %4071 = vset.pattern.permute.xlu0 %v4099_v2 }
  0x5d   : > { %1402 = vperm.xlu0 %4071, %v4321_v29  }
  0x60   : > { %4055 = vset.pattern.permute.xlu1 %v4099_v2 }
  0x61   : > { %722 = vperm.xlu1 %4055, %v704_v20   ;;  %1407 = vperm.xlu0 %4071, %v4361_v36  }
  0x65   : > { %4056 = vset.pattern.permute.xlu1 %v4098_v1  ;;  %1561 = vperm.xlu0 %4071, %v1551_v37  }
  0x66   : > { %742 = vperm.xlu1 %4056, %v703_v21  }
  0x69   : > { %1422 = vperm.xlu0 %4071, %v4341_v33  }
  0x6a   : > { %4058 = vset.pattern.permute.xlu1 %v4100_v9 }
  0x6b   : > { %770 = vperm.xlu1 %4058, %v703_v21  }
  0x6d   : > { %1571 = vperm.xlu0 %4071, %v1553_v38  }
  0x6f   : > { %774 = vperm.xlu1 %4058, %v704_v20  }
  0x71   : > { %1432 = vperm.xlu0 %4071, %v4352_v35  }
  0x73   : > { %4059 = vset.pattern.permute.xlu1 %v4099_v2 }
  0x74   : > { %800 = vperm.xlu1 %4059, %v790_v39  }
  0x75   : > { %1581 = vperm.xlu0 %4071, %v1555_v40  }
  0x78   : > { %805 = vperm.xlu1 %4059, %v791_v41  }
  0x79   : > { %1596 = vperm.xlu0 %4071, %v1558_v42  }
  0x7c   : > { %1397 = vperm.xlu1 %4059, %v1387_v43  }
  0x7d   : > { %1214 = vperm.xlu0 %4071, %v1200_v44  }
  0x80   : > { %4060 = vset.pattern.permute.xlu1 %v4098_v1 }
  0x81   : > { %1448 = vperm.xlu1 %4060, %v1387_v43   ;;  %1224 = vperm.xlu0 %4071, %v1202_v45  }
  0x85   : > { %4062 = vset.pattern.permute.xlu1 %v4100_v9  ;;  %1234 = vperm.xlu0 %4071, %v1204_v47   ;;  %v1554_v47 = vld [vmem:[%s5160_s12 + $0x18] sm:$0xff] }
  0x86   : > { %1500 = vperm.xlu1 %4062, %v1387_v43  }
  0x89   : > { %v1065_v49 = vpop.permute.xlu1 %1064  ;;  %v1026_v50 = vpop.permute.xlu0 %1025  ;;  %1244 = vperm.xlu0 %4071, %v1206_v48  }
  0x8a   : > { %1504 = vperm.xlu1 %4062, %v4321_v29   ;;  %v1091_v19 = vmul.f32 %v4445_v4, %v1065_v49  ;;  %v1057_v20 = vmul.f32 %v4448_v6, %v1026_v50  ;;  %v1630_v29 = vld [vmem:[%s5162_s14 + $0x38] sm:$0xff]  ;;  %v1393_v50 = vld [vmem:[%s5159_s11 + $0x30] sm:$0xff] }
  0x8c   : > { %v1097_v30 = vadd.f32 %v1091_v19, %v1057_v20 }
  0x8d   : > { %v1069_v52 = vpop.permute.xlu1 %1068  ;;  %v1031_v53 = vpop.permute.xlu0 %1030  ;;  %844 = vperm.xlu0 %4071, %v830_v51  }
  0x8e   : > { %4063 = vset.pattern.permute.xlu1 %v4099_v2  ;;  %v1092_v14 = vmul.f32 %v4445_v4, %v1069_v52  ;;  %v1058_v15 = vmul.f32 %v4448_v6, %v1031_v53 }
  0x8f   : > { %1412 = vperm.xlu1 %4063, %v4335_v32  }
  0x90   : > { %v1098_v21 = vadd.f32 %v1092_v14, %v1058_v15 }
  0x91   : > { %v4418_v55 = vpop.permute.xlu0 %1040  ;;  %854 = vperm.xlu0 %4071, %v832_v54  }
  0x92   : > { %v1109_v56 = vpop.permute.xlu1 %1108  ;;  %v1060_v54 = vmul.f32 %v4448_v6, %v4418_v55 }
  0x93   : > { %4064 = vset.pattern.permute.xlu1 %v4098_v1  ;;  %v1132_v17 = vmul.f32 %v4451_v5, %v1109_v56 }
  0x94   : > { %1456 = vperm.xlu1 %4064, %v4361_v36  }
  0x95   : > { %v1157_v58 = vpop.permute.xlu0 %1156  ;;  %864 = vperm.xlu0 %4071, %v834_v57   ;;  %v1138_v24 = vadd.f32 %v1132_v17, %v1098_v21 }
  0x97   : > { %v4432_v60 = vpop.permute.xlu1 %1035  ;;  %v1180_v34 = vadd.f32 %v1157_v58, %v1138_v24 }
  0x98   : > { %4065 = vset.pattern.permute.xlu1 %v4100_v9  ;;  %v1059_v56 = vmul.f32 %v4448_v6, %v4432_v60 }
  0x99   : > { %1508 = vperm.xlu1 %4065, %v4361_v36   ;;  %874 = vperm.xlu0 %4071, %v836_v59   ;;  %v1186_v40 = vmax.f32 %v1180_v34, 0.0 }
  0x9a   : > { %v4439_v63 = vpop.permute.xlu0 %1080 }
  0x9b   : > { %v1095_v58 = vmul.f32 %v4445_v4, %v4439_v63 }
  0x9c   : > { %v1073_v3 = vpop.permute.xlu1 %1072 }
  0x9d   : > { %1512 = vperm.xlu1 %4065, %v4335_v32   ;;  %1638 = vperm.xlu0 %4071, %v1624_v0  }
  0x9f   : > { %v1105_v16 = vpop.permute.xlu0 %1104 }
  0xa0   : > { %v1077_v8 = vpop.permute.xlu1 %1076  ;;  %v1131_v25 = vmul.f32 %v4451_v5, %v1105_v16 }
  0xa1   : > { %4066 = vset.pattern.permute.xlu1 %v4099_v2  ;;  %1648 = vperm.xlu0 %4071, %v1626_v11   ;;  %v1094_v59 = vmul.f32 %v4445_v4, %v1077_v8 }
  0xa2   : > { %1566 = vperm.xlu1 %4066, %v1552_v7   ;;  %v1137_v36 = vadd.f32 %v1131_v25, %v1097_v30 }
  0xa3   : > { %v1113_v23 = vpop.permute.xlu0 %1112  ;;  %v1100_v16 = vadd.f32 %v1094_v59, %v1060_v54 }
  0xa4   : > { %v1133_v62 = vmul.f32 %v4451_v5, %v1113_v23 }
  0xa5   : > { %v1117_v28 = vpop.permute.xlu1 %1116  ;;  %1658 = vperm.xlu0 %4071, %v1628_v18  }
  0xa6   : > { %1417 = vperm.xlu1 %4066, %v1391_v22   ;;  %v1134_v55 = vmul.f32 %v4451_v5, %v1117_v28 }
  0xa7   : > { %v1125_v32 = vpop.permute.xlu0 %1124 }
  0xa8   : > { %v1136_v18 = vmul.f32 %v4451_v5, %v1125_v32 }
  0xa9   : > { %1668 = vperm.xlu0 %4071, %v1630_v29  }
  0xaa   : > { %v1152_v37 = vpop.permute.xlu1 %1151  ;;  %4067 = vset.pattern.permute.xlu1 %v4098_v1 }
  0xab   : > { %v1179_v38 = vadd.f32 %v1152_v37, %v1137_v36  ;;  %1464 = vperm.xlu1 %4067, %v1391_v22  }
  0xac   : > { %v1172_v39 = vpop.permute.xlu0 %1171 }
  0xad   : > { %v1185_v41 = vmax.f32 %v1179_v38, 0.0 }
  0xae   : > { %v1046_v42 = vpop.permute.xlu1 %1045 }
  0xaf   : > { %4068 = vset.pattern.permute.xlu1 %v4100_v9  ;;  %v3831_v43 = vpack.c.bf16 %v1186_v40, %v1185_v41  ;;  %v1061_v0 = vmul.f32 %v4448_v6, %v1046_v42  ;;  %v1192_v40 = vld [vmem:[%s5157_s9 + $0x8] sm:$0xff]  ;;  %v1193_v42 = vld [vmem:[%s5157_s9 + $0x10] sm:$0xff] }
  0xb0   : > { %1516 = vperm.xlu1 %4068, %v1391_v22   ;;  %v1140_v22 = vadd.f32 %v1134_v55, %v1100_v16  ;;  %v1198_v55 = vld [vmem:[%s5157_s9 + $0x38] sm:$0xff] }
  0xb1   : > { %3832 = vmatprep.subr.bf16.mxu1 %v3831_v43  ;;  %v739_v44 = vpop.permute.xlu0 %738  ;;  %v1101_v63 = vadd.f32 %v1095_v58, %v1061_v0 }
  0xb2   : > { %v1051_v45 = vpop.permute.xlu1 %1050  ;;  %3834 = vmatpush3.bf16.msra.mxu1 %v3831_v43  ;;  %v754_v49 = vmul.f32 %v4313_v27, %v739_v44 }
  0xb3   : > { %v1062_v7 = vmul.f32 %v4448_v6, %v1051_v45  ;;  %v780_v45 = vrot.slane %v4309_v26, %v4436_v61  ;;  %v1201_v26 = vld [vmem:[%s5158_s10 + $0x10] sm:$0xff] }
  0xb4   : > { %1520 = vperm.xlu1 %4068, %v4341_v33   ;;  %v1093_v33 = vmul.f32 %v4445_v4, %v1073_v3 }
  0xb5   : > { %v4479_v46 = vpop.permute.xlu0 %746 }
  0xb6   : > { %v1099_v11 = vadd.f32 %v1093_v33, %v1059_v56  ;;  %v1197_v56 = vld [vmem:[%s5157_s9 + $0x30] sm:$0xff]  ;;  %v756_v16 = vmul.f32 %v4313_v27, %v4479_v46 }
  0xb7   : > { %v1085_v48 = vpop.permute.xlu1 %1084 }
  0xb8   : > { %4069 = vset.pattern.permute.xlu1 %v4099_v2  ;;  %v1096_v14 = vmul.f32 %v4445_v4, %v1085_v48  ;;  %v1139_v8 = vadd.f32 %v1133_v62, %v1099_v11  ;;  %v1199_v48 = vld [vmem:[%s5158_s10] sm:$0xff] }
  0xb9   : > { %1576 = vperm.xlu1 %4069, %v1554_v47   ;;  %v1203_v11 = vld [vmem:[%s5158_s10 + $0x20] sm:$0xff] }
  0xba   : > { %v713_v51 = vpop.permute.xlu0 %712  ;;  %v1102_v19 = vadd.f32 %v1096_v14, %v1062_v7 }
  0xbb   : > { %v730_v52 = vmul.f32 %v4330_v31, %v713_v51 }
  0xbc   : > { %v1121_v53 = vpop.permute.xlu1 %1120  ;;  %v1142_v28 = vadd.f32 %v1136_v18, %v1102_v19 }
  0xbd   : > { %1427 = vperm.xlu1 %4069, %v1393_v50   ;;  %v4495_v57 = vadd.f32 %v754_v49, %v730_v52  ;;  %v1135_v60 = vmul.f32 %v4451_v5, %v1121_v53  ;;  %v1194_v49 = vld [vmem:[%s5157_s9 + $0x18] sm:$0xff]  ;;  %v1196_v53 = vld [vmem:[%s5157_s9 + $0x28] sm:$0xff] }
  0xbe   : > { %v4502_v3 = vpop.permute.xlu0 %717 }
  0xbf   : > { %v1141_v20 = vadd.f32 %v1135_v60, %v1101_v63  ;;  %v731_v46 = vmul.f32 %v4330_v31, %v4502_v3 }
  0xc1   : > { %v1162_v15 = vpop.permute.xlu1 %1161  ;;  %4070 = vset.pattern.permute.xlu1 %v4098_v1  ;;  %v1183_v1 = vadd.f32 %v1172_v39, %v1141_v20 }
  0xc2   : > { %1472 = vperm.xlu1 %4070, %v1393_v50   ;;  %v4509_v17 = vpop.permute.xlu0 %795  ;;  %v1181_v21 = vadd.f32 %v1162_v15, %v1139_v8  ;;  %v1621_v15 = vld [vmem:[%s5161_s13 + $0x30] sm:$0xff] }
  0xc3   : > { %v1189_v32 = vmax.f32 %v1183_v1, 0.0 }
  0xc4   : > { %v1187_v25 = vmax.f32 %v1181_v21, 0.0 }
  0xc5   : > { %v1167_v4 = vpop.permute.xlu1 %1166 }
  0xc6   : > { %v1182_v23 = vadd.f32 %v1167_v4, %v1140_v22  ;;  %4072 = vset.pattern.permute.xlu1 %v4100_v9  ;;  %v4513_v24 = vpop.permute.xlu0 %810  ;;  %v1556_v9 = vld [vmem:[%s5160_s12 + $0x28] sm:$0xff]  ;;  %v829_v22 = vld [vmem:[%s5154_s6] sm:$0xff] }
  0xc7   : > { %1524 = vperm.xlu1 %4072, %v1393_v50   ;;  %v1195_v50 = vld [vmem:[%s5157_s9 + $0x20] sm:$0xff] }
  0xc8   : > { %v1188_v6 = vmax.f32 %v1182_v23, 0.0 }
  0xc9   : > { %v1177_v29 = vpop.permute.xlu1 %1176 }
  0xca   : > { %v3835_v30 = vpack.c.bf16 %v1188_v6, %v1187_v25  ;;  %v1184_v34 = vadd.f32 %v1177_v29, %v1142_v28  ;;  %v831_v6 = vld [vmem:[%s5154_s6 + $0x10] sm:$0xff] }
  0xcb   : > { %1528 = vperm.xlu1 %4072, %v4352_v35   ;;  %v1453_v5 = vpop.permute.xlu0 %1452  ;;  %v1557_v35 = vld [vmem:[%s5160_s12 + $0x30] sm:$0xff] }
  0xcc   : > { %v1190_v36 = vmax.f32 %v1184_v34, 0.0  ;;  %3836 = vmatprep.subr.bf16.mxu1 %v3835_v30  ;;  %v1484_v58 = vmul.f32 %v4251_v12, %v1453_v5 }
  0xcd   : > { %v708_v37 = vpop.permute.xlu1 %707  ;;  %3838 = vmatpush3.bf16.msra.mxu1 %v3835_v30 }
  0xce   : > { %v3839_v38 = vpack.c.bf16 %v1190_v36, %v1189_v32 }
  0xcf   : > { %4073 = vset.pattern.permute.xlu1 %v4099_v2  ;;  %v4520_v39 = vpop.permute.xlu0 %1460  ;;  %v729_v2 = vmul.f32 %v4330_v31, %v708_v37 }
  0xd0   : > { %1586 = vperm.xlu1 %4073, %v1556_v9   ;;  %3840 = vmatprep.subr.bf16.mxu1 %v3839_v38 }
  0xd1   : > { %3842 = vmatpush3.bf16.msra.mxu1 %v3839_v38  ;;  %v835_v38 = vld [vmem:[%s5154_s6 + $0x30] sm:$0xff] }
  0xd2   : > { %v735_v41 = vpop.permute.xlu1 %734 }
  0xd3   : > { %v753_v43 = vmul.f32 %v4313_v27, %v735_v41  ;;  %v1469_v44 = vpop.permute.xlu0 %1468 }
  0xd4   : > { %1591 = vperm.xlu1 %4073, %v1557_v35   ;;  %3784 = vmatmul.mubr.msk.f32.vlgmr.msra.gmra.mrb[0].mxu1 %vm1247_vm0, %v1192_v40  ;;  %v1488_v23 = vmul.f32 %v4251_v12, %v1469_v44 }
  0xd5   : > { %v757_v47 = vadd.f32 %v753_v43, %v729_v2  ;;  %3786 = vmatprep.mubr.msk.f32.mxu1 %vm1247_vm0, %v1193_v42  ;;  %v1623_v43 = vld [vmem:[%s5162_s14] sm:$0xff] }
  0xd7   : > { %v763_v51 = vpop.permute.xlu1 %762  ;;  %v1477_v52 = vpop.permute.xlu0 %1476 }
  0xd8   : > { %v781_v33 = vmul.f32 %v780_v45, %v763_v51  ;;  %1209 = vperm.xlu1 %4073, %v1199_v48   ;;  %3787 = vmatmul.mubr.msk.f32.gmra.mrb[2].mxu1 %vm1247_vm0, %v1194_v49  ;;  %v1490_v32 = vmul.f32 %v4251_v12, %v1477_v52 }
  0xd9   : > { %3789 = vmatprep.mubr.msk.f32.mxu1 %vm1247_vm0, %v1195_v50 }
  0xda   : > { %v785_v54 = vadd.f32 %v781_v33, %v757_v47 }
  0xdb   : > { %v767_v59 = vpop.permute.xlu1 %766 }
  0xdc   : > { %v782_v62 = vmul.f32 %v780_v45, %v767_v59  ;;  %1219 = vperm.xlu1 %4073, %v1201_v26   ;;  %3790 = vmatmul.mubr.msk.f32.gmra.mrb[4].mxu1 %vm1247_vm0, %v1196_v53  ;;  %v1403_v0 = vpop.permute.xlu0 %1402  ;;  %v813_v40 = vadd.f32 %v4509_v17, %v785_v54  ;;  %v1625_v17 = vld [vmem:[%s5162_s14 + $0x10] sm:$0xff]  ;;  %v822_v53 = vld [vmem:[%s5153_s5 + $0x8] sm:$0xff] }
  0xdd   : > { %3792 = vmatprep.mubr.msk.f32.mxu1 %vm1247_vm0, %v1197_v56  ;;  %v1440_v14 = vmul.f32 %v4255_v13, %v1403_v0  ;;  %v823_v56 = vld [vmem:[%s5153_s5 + $0x10] sm:$0xff]  ;;  %v4634_v0 = vrot.slane %v4244_v10, %v4436_v61  ;;  %v826_v10 = vld [vmem:[%s5153_s5 + $0x28] sm:$0xff] }
  0xde   : > { %v786_v60 = vadd.f32 %v782_v62, %v4495_v57  ;;  %v1205_v57 = vld [vmem:[%s5158_s10 + $0x30] sm:$0xff]  ;;  %v817_v47 = vmax.f32 %v813_v40, 0.0 }
  0xdf   : > { %v4573_v63 = vadd.f32 %v1484_v58, %v1440_v14  ;;  %v1629_v62 = vld [vmem:[%s5162_s14 + $0x30] sm:$0xff]  ;;  %v825_v14 = vld [vmem:[%s5153_s5 + $0x20] sm:$0xff] }
  0xe0   : > { %1229 = vperm.xlu1 %4073, %v1203_v11   ;;  %v723_v7 = vpop.permute.xlu1 %722  ;;  %3793 = vmatmul.mubr.msk.f32.gmra.mrb[6].mxu1 %vm1247_vm0, %v1198_v55  ;;  %v4576_v8 = vpop.permute.xlu0 %1407  ;;  %v824_v55 = vld [vmem:[%s5153_s5 + $0x18] sm:$0xff] }
  0xe1   : > { %v732_v18 = vmul.f32 %v4330_v31, %v723_v7  ;;  %3820 = vmatprep.mubr.msk.f32.mxu1 %vm1671_vm2, %v1621_v15 }
  0xe3   : > { %v760_v19 = vadd.f32 %v756_v16, %v732_v18  ;;  %v827_v16 = vld [vmem:[%s5153_s5 + $0x30] sm:$0xff] }
  0xe4   : > { %1239 = vperm.xlu1 %4073, %v1205_v57   ;;  %v4585_v20 = vpop.permute.xlu0 %1561  ;;  %v828_v57 = vld [vmem:[%s5153_s5 + $0x38] sm:$0xff] }
  0xe5   : > { %v743_v21 = vpop.permute.xlu1 %742 }
  0xe6   : > { %v755_v4 = vmul.f32 %v4313_v27, %v743_v21  ;;  %v833_v27 = vld [vmem:[%s5154_s6 + $0x20] sm:$0xff]  ;;  %v1486_v21 = vmul.f32 %v4251_v12, %v4520_v39 }
  0xe8   : > { %v759_v1 = vadd.f32 %v755_v4, %v731_v46  ;;  %839 = vperm.xlu1 %4073, %v829_v22   ;;  %v1423_v25 = vpop.permute.xlu0 %1422  ;;  %v1615_v46 = vld [vmem:[%s5161_s13] sm:$0xff] }
  0xe9   : > { %v1444_v31 = vmul.f32 %v4255_v13, %v1423_v25 }
  0xea   : > { %v771_v3 = vpop.permute.xlu1 %770 }
  0xeb   : > { %v783_v28 = vmul.f32 %v780_v45, %v771_v3  ;;  %v4596_v29 = vadd.f32 %v1488_v23, %v1444_v31 }
  0xec   : > { %849 = vperm.xlu1 %4073, %v831_v6   ;;  %v4598_v30 = vpop.permute.xlu0 %1571 }
  0xed   : > { %v787_v34 = vadd.f32 %v783_v28, %v759_v1  ;;  %v1441_v1 = vmul.f32 %v4255_v13, %v4576_v8 }
  0xee   : > { %v775_v5 = vpop.permute.xlu1 %774 }
  0xef   : > { %v784_v36 = vmul.f32 %v780_v45, %v775_v5 }
  0xf0   : > { %859 = vperm.xlu1 %4073, %v833_v27   ;;  %v1433_v37 = vpop.permute.xlu0 %1432 }
  0xf1   : > { %v788_v9 = vadd.f32 %v784_v36, %v760_v19  ;;  %v1446_v35 = vmul.f32 %v4255_v13, %v1433_v37 }
  0xf3   : > { %v801_v41 = vpop.permute.xlu1 %800  ;;  %v4609_v42 = vadd.f32 %v1490_v32, %v1446_v35  ;;  %v816_v44 = vadd.f32 %v4513_v24, %v788_v9  ;;  %v1627_v24 = vld [vmem:[%s5162_s14 + $0x20] sm:$0xff] }
  0xf4   : > { %v814_v2 = vadd.f32 %v801_v41, %v786_v60  ;;  %869 = vperm.xlu1 %4073, %v835_v38  }
  0xf5   : > { %v820_v52 = vmax.f32 %v816_v44, 0.0 }
  0xf6   : > { %v818_v45 = vmax.f32 %v814_v2, 0.0 }
  0xf7   : > { %v806_v48 = vpop.permute.xlu1 %805 }
  0xf8   : > { %v815_v49 = vadd.f32 %v806_v48, %v787_v34  ;;  %1633 = vperm.xlu1 %4073, %v1623_v43   ;;  %v3823_v50 = vpack.c.bf16 %v818_v45, %v817_v47 }
  0xfa   : > { %v819_v51 = vmax.f32 %v815_v49, 0.0  ;;  %3824 = vmatprep.subr.bf16.mxu0 %v3823_v50 }
  0xfb   : > { %v1398_v33 = vpop.permute.xlu1 %1397  ;;  %3826 = vmatpush3.bf16.msra.mxu0 %v3823_v50 }
  0xfc   : > { %v3827_v26 = vpack.c.bf16 %v820_v52, %v819_v51  ;;  %1643 = vperm.xlu1 %4073, %v1625_v17   ;;  %v1439_v58 = vmul.f32 %v4255_v13, %v1398_v33 }
  0xfe   : > { %3828 = vmatprep.subr.bf16.mxu0 %v3827_v26 }
  0xff   : > { %3830 = vmatpush3.bf16.msra.mxu0 %v3827_v26 }
 0x100   : > { %1653 = vperm.xlu1 %4073, %v1627_v24   ;;  %v1449_v54 = vpop.permute.xlu1 %1448 }
 0x101   : > { %v1483_v59 = vmul.f32 %v4251_v12, %v1449_v54 }
 0x102   : > { %3760 = vmatmul.mubr.msk.f32.vlgmr.msra.gmra.mrb[0].mxu0 %vm877_vm1, %v822_v53 }
 0x103   : > { %v1491_v11 = vadd.f32 %v1483_v59, %v1439_v58  ;;  %3762 = vmatprep.mubr.msk.f32.mxu0 %vm877_vm1, %v823_v56 }
 0x104   : > { %1663 = vperm.xlu1 %4073, %v1629_v62   ;;  %v1582_v62 = vpop.permute.xlu0 %1581 }
 0x105   : > { %v1501_v60 = vpop.permute.xlu1 %1500 }
 0x106   : > { %v1535_v15 = vmul.f32 %v4634_v0, %v1501_v60  ;;  %3763 = vmatmul.mubr.msk.f32.gmra.mrb[2].mxu0 %vm877_vm1, %v824_v55 }
 0x107   : > { %3765 = vmatprep.mubr.msk.f32.mxu0 %vm877_vm1, %v825_v14 }
 0x108   : > { %v1543_v61 = vadd.f32 %v1535_v15, %v1491_v11 }
 0x109   : > { %v1505_v7 = vpop.permute.xlu1 %1504 }
 0x10a   : > { %v1536_v18 = vmul.f32 %v4634_v0, %v1505_v7  ;;  %3766 = vmatmul.mubr.msk.f32.gmra.mrb[4].mxu0 %vm877_vm1, %v826_v10  ;;  %v1599_v5 = vadd.f32 %v4585_v20, %v1543_v61  ;;  %v1597_v10 = vpop.permute.xlu0 %1596 }
 0x10b   : > { %3768 = vmatprep.mubr.msk.f32.mxu0 %vm877_vm1, %v827_v16 }
 0x10c   : > { %v1544_v19 = vadd.f32 %v1536_v18, %v4573_v63  ;;  %v1607_v37 = vmax.f32 %v1599_v5, 0.0 }
 0x10e   : > { %v1413_v22 = vpop.permute.xlu1 %1412  ;;  %3769 = vmatmul.mubr.msk.f32.gmra.mrb[6].mxu0 %vm877_vm1, %v828_v57 }
 0x10f   : > { %v1442_v4 = vmul.f32 %v4255_v13, %v1413_v22  ;;  %3811 = vmatprep.mubr.msk.f32.mxu0 %vm1671_vm2, %v1615_v46  ;;  %v1622_v22 = vld [vmem:[%s5161_s13 + $0x38] sm:$0xff] }
 0x111   : > { %v1494_v23 = vadd.f32 %v1486_v21, %v1442_v4  ;;  %v1616_v21 = vld [vmem:[%s5161_s13 + $0x8] sm:$0xff]  ;;  %v1617_v4 = vld [vmem:[%s5161_s13 + $0x10] sm:$0xff] }
 0x113   : > { %v1457_v25 = vpop.permute.xlu1 %1456 }
 0x114   : > { %v1485_v63 = vmul.f32 %v4251_v12, %v1457_v25  ;;  %v1846_v25 = vld [vmem:[%s5164_s16 + $0x28] sm:$0xff] }
 0x116   : > { %v1493_v6 = vadd.f32 %v1485_v63, %v1441_v1  ;;  %v1843_v1 = vld [vmem:[%s5164_s16 + $0x10] sm:$0xff]  ;;  %v1848_v63 = vld [vmem:[%s5164_s16 + $0x38] sm:$0xff] }
 0x118   : > { %v1509_v31 = vpop.permute.xlu1 %1508 }
 0x119   : > { %v1537_v3 = vmul.f32 %v4634_v0, %v1509_v31  ;;  %v1619_v31 = vld [vmem:[%s5161_s13 + $0x20] sm:$0xff] }
 0x11b   : > { %v1545_v28 = vadd.f32 %v1537_v3, %v1493_v6  ;;  %v1618_v6 = vld [vmem:[%s5161_s13 + $0x18] sm:$0xff]  ;;  %v4101_v3 = vmov 0.0  }
 0x11c   : > { %v1513_v39 = vpop.permute.xlu1 %1512 }
 0x11d   : > { %v1538_v27 = vmul.f32 %v4634_v0, %v1513_v39  ;;  %v1601_v49 = vadd.f32 %v4598_v30, %v1545_v28  ;;  %v1620_v28 = vld [vmem:[%s5161_s13 + $0x28] sm:$0xff]  ;;  %v1215_v39 = vpop.permute.xlu0 %1214 }
 0x11f   : > { %v1546_v34 = vadd.f32 %v1538_v27, %v1494_v23  ;;  %v1609_v51 = vmax.f32 %v1601_v49, 0.0  ;;  %v1841_v23 = vld [vmem:[%s5164_s16] sm:$0xff] }
 0x121   : > { %v1567_v32 = vpop.permute.xlu1 %1566 }
 0x122   : > { %v1600_v36 = vadd.f32 %v1567_v32, %v1544_v19 }
 0x124   : > { %v1608_v9 = vmax.f32 %v1600_v36, 0.0 }
 0x125   : > { %v1418_v38 = vpop.permute.xlu1 %1417 }
 0x126   : > { %v3843_v8 = vpack.c.bf16 %v1608_v9, %v1607_v37  ;;  %v1443_v40 = vmul.f32 %v4255_v13, %v1418_v38 }
 0x128   : > { %3844 = vmatprep.subr.bf16.mxu0 %v3843_v8  ;;  %3875 = vmatprep.subr.bf16.mxu1 %v3843_v8 }
 0x129   : > { %3846 = vmatpush3.bf16.msra.mxu0 %v3843_v8  ;;  %3879 = vmatpush3.bf16.msra.mxu1 %v3843_v8 }
 0x12a   : > { %v1465_v35 = vpop.permute.xlu1 %1464 }
 0x12b   : > { %v1487_v41 = vmul.f32 %v4251_v12, %v1465_v35 }
 0x12d   : > { %v1495_v2 = vadd.f32 %v1487_v41, %v1443_v40 }
 0x12f   : > { %v1517_v43 = vpop.permute.xlu1 %1516 }
 0x130   : > { %v1539_v44 = vmul.f32 %v4634_v0, %v1517_v43  ;;  %v1818_v43 = vld [vmem:[%s5163_s15 + $0x8] sm:$0xff] }
 0x132   : > { %v1547_v20 = vadd.f32 %v1539_v44, %v1495_v2 }
 0x133   : > { %v1521_v45 = vpop.permute.xlu1 %1520 }
 0x134   : > { %v1540_v47 = vmul.f32 %v4634_v0, %v1521_v45  ;;  %v1603_v14 = vadd.f32 %v1582_v62, %v1547_v20  ;;  %v1826_v20 = vld [vmem:[%s5163_s15 + $0x48] sm:$0xff]  ;;  %v1820_v45 = vld [vmem:[%s5163_s15 + $0x18] sm:$0xff] }
 0x136   : > { %v1548_v48 = vadd.f32 %v1540_v47, %v4596_v29  ;;  %v1611_v16 = vmax.f32 %v1603_v14, 0.0  ;;  %v1828_v47 = vld [vmem:[%s5163_s15 + $0x58] sm:$0xff] }
 0x138   : > { %v1577_v50 = vpop.permute.xlu1 %1576 }
 0x139   : > { %v1602_v17 = vadd.f32 %v1577_v50, %v1546_v34  ;;  %v1225_v34 = vpop.permute.xlu0 %1224 }
 0x13b   : > { %v1610_v52 = vmax.f32 %v1602_v17, 0.0 }
 0x13c   : > { %v1428_v33 = vpop.permute.xlu1 %1427 }
 0x13d   : > { %v3847_v26 = vpack.c.bf16 %v1610_v52, %v1609_v51  ;;  %v1445_v53 = vmul.f32 %v4255_v13, %v1428_v33  ;;  %v1235_v40 = vpop.permute.xlu0 %1234  ;;  %v1845_v51 = vld [vmem:[%s5164_s16 + $0x20] sm:$0xff]  ;;  %v1847_v52 = vld [vmem:[%s5164_s16 + $0x30] sm:$0xff]  ;;  %v3859_v33 = vpack.c.bf16 %v1826_v20, %v1818_v43 }
 0x13e   : > { %v1829_v43 = vld [vmem:[%s5163_s15 + $0x60] sm:$0xff]  ;;  %v1831_v20 = vld [vmem:[%s5163_s15 + $0x70] sm:$0xff] }
 0x13f   : > { %3848 = vmatprep.subr.bf16.mxu0 %v3847_v26  ;;  %3876 = vmatprep.subr.bf16.mxu1 %v3847_v26 }
 0x140   : > { %3850 = vmatpush3.bf16.msra.mxu0 %v3847_v26  ;;  %3880 = vmatpush3.bf16.msra.mxu1 %v3847_v26  ;;  %v3863_v26 = vpack.c.bf16 %v1828_v47, %v1820_v45 }
 0x141   : > { %v1473_v24 = vpop.permute.xlu1 %1472 }
 0x142   : > { %v1489_v54 = vmul.f32 %v4251_v12, %v1473_v24  ;;  %v1245_v24 = vpop.permute.xlu0 %1244 }
 0x144   : > { %v1497_v56 = vadd.f32 %v1489_v54, %v1445_v53 }
 0x146   : > { %v1525_v58 = vpop.permute.xlu1 %1524 }
 0x147   : > { %v1541_v29 = vmul.f32 %v4634_v0, %v1525_v58 }
 0x149   : > { %v1549_v30 = vadd.f32 %v1541_v29, %v1497_v56 }
 0x14a   : > { %v1529_v59 = vpop.permute.xlu1 %1528 }
 0x14b   : > { %v1542_v11 = vmul.f32 %v4634_v0, %v1529_v59  ;;  %v1844_v0 = vld [vmem:[%s5164_s16 + $0x18] sm:$0xff] }
 0x14d   : > { %v1550_v55 = vadd.f32 %v1542_v11, %v4609_v42  ;;  %v1842_v42 = vld [vmem:[%s5164_s16 + $0x8] sm:$0xff] }
 0x14f   : > { %v1587_v60 = vpop.permute.xlu1 %1586  ;;  %v1606_v61 = vadd.f32 %v1597_v10, %v1550_v55  ;;  %v1819_v10 = vld [vmem:[%s5163_s15 + $0x10] sm:$0xff] }
 0x150   : > { %v1604_v15 = vadd.f32 %v1587_v60, %v1548_v48  ;;  %v1817_v60 = vld [vmem:[%s5163_s15] sm:$0xff] }
 0x151   : > { %v1614_v19 = vmax.f32 %v1606_v61, 0.0 }
 0x152   : > { %v1612_v13 = vmax.f32 %v1604_v15, 0.0  ;;  %v1825_v15 = vld [vmem:[%s5163_s15 + $0x40] sm:$0xff] }
 0x153   : > { %v1592_v7 = vpop.permute.xlu1 %1591 }
 0x154   : > { %v3851_v12 = vpack.c.bf16 %v1612_v13, %v1611_v16  ;;  %v1605_v18 = vadd.f32 %v1592_v7, %v1549_v30  ;;  %v1827_v16 = vld [vmem:[%s5163_s15 + $0x50] sm:$0xff]  ;;  %v1822_v13 = vld [vmem:[%s5163_s15 + $0x28] sm:$0xff]  ;;  %v845_v7 = vpop.permute.xlu0 %844 }
 0x156   : > { %v1613_v57 = vmax.f32 %v1605_v18, 0.0  ;;  %3852 = vmatprep.subr.bf16.mxu0 %v3851_v12  ;;  %3877 = vmatprep.subr.bf16.mxu1 %v3851_v12  ;;  %v1824_v18 = vld [vmem:[%s5163_s15 + $0x38] sm:$0xff] }
 0x157   : > { %3854 = vmatpush3.bf16.msra.mxu0 %v3851_v12  ;;  %3881 = vmatpush3.bf16.msra.mxu1 %v3851_v12  ;;  %v1210_v27 = vpop.permute.xlu1 %1209  ;;  %v1830_v12 = vld [vmem:[%s5163_s15 + $0x68] sm:$0xff] }
 0x158   : > { %v3855_v46 = vpack.c.bf16 %v1614_v19, %v1613_v57  ;;  %v1832_v57 = vld [vmem:[%s5163_s15 + $0x78] sm:$0xff] }
 0x15a   : > { %3856 = vmatprep.subr.bf16.mxu0 %v3855_v46  ;;  %3878 = vmatprep.subr.bf16.mxu1 %v3855_v46 }
 0x15b   : > { %3858 = vmatpush3.bf16.msra.mxu0 %v3855_v46  ;;  %3882 = vmatpush3.bf16.msra.mxu1 %v3855_v46  ;;  %v1220_v32 = vpop.permute.xlu1 %1219  ;;  %v3861_v46 = vpack.c.bf16 %v1825_v15, %v1817_v60 }
 0x15c   : > { %1874 = vmatprep.subr.mxu1 %v1842_v42  ;;  %1987 = vmatprep.subr.mxu0 %v1844_v0  ;;  %v3865_v42 = vpack.c.bf16 %v1827_v16, %v1819_v10  ;;  %v3867_v0 = vpack.c.bf16 %v1830_v12, %v1822_v13 }
 0x15e   : > { %3812 = vmatmul.mubr.msk.f32.vlgmr.msra.gmra.mrb[8].mxu0 %vm1671_vm2, %v1616_v21  ;;  %3821 = vmatmul.mubr.msk.f32.vlgmr.msra.gmra.mrb[8].mxu1 %vm1671_vm2, %v1622_v22  ;;  %v3871_v21 = vpack.c.bf16 %v1832_v57, %v1824_v18  ;;  %v855_v22 = vpop.permute.xlu0 %854 }
 0x15f   : > { %3814 = vmatprep.mubr.msk.f32.mxu0 %vm1671_vm2, %v1617_v4  ;;  %1875 = vmatpush1.msra.mxu1 %v1841_v23  ;;  %v1230_v2 = vpop.permute.xlu1 %1229 }
 0x160   : > { %1938 = vmatprep.mubr.f32.mxu1 %v4101_v3  ;;  %1988 = vmatpush1.msra.mxu0 %v1843_v1 }
 0x161   : > { %2100 = vmatprep.subr.mxu1 %v1846_v25  ;;  %2213 = vmatprep.subr.mxu0 %v1848_v63 }
 0x162   : > { %3815 = vmatmul.mubr.msk.f32.gmra.mrb[10].mxu0 %vm1671_vm2, %v1618_v6 }
 0x163   : > { %3817 = vmatprep.mubr.msk.f32.mxu0 %vm1671_vm2, %v1619_v31  ;;  %v1240_v54 = vpop.permute.xlu1 %1239 }
 0x166   : > { %3818 = vmatmul.mubr.msk.f32.gmra.mrb[12].mxu0 %vm1671_vm2, %v1620_v28 }
 0x167   : > { %2051 = vmatprep.mubr.f32.mxu0 %v4101_v3  ;;  %v840_v19 = vpop.permute.xlu1 %839 }
 0x16b   : > { %v850_v23 = vpop.permute.xlu1 %849 }
 0x1a7   : > { %v3785_v5 = vpop.f32.mrb[0].mxu1 }
 0x1a8   : > { %v1344_v36 = vadd.f32 %v3785_v5, %v1215_v39  ;;  %v1338_v37 = vpop.f32.mrb[1].mxu1  ;;  %v865_v39 = vpop.permute.xlu0 %864 }
 0x1a9   : > { %v1339_v9 = vadd.f32 %v1338_v37, %v1210_v27 }
 0x1aa   : > { %1379 = vst.msk [vmem:[#allocation3 + $0x8] sm:$0xff] %vm1377_vm3, %v1344_v36 }
 0x1ab   : > { %1378 = vst.msk [vmem:[#allocation3] sm:$0xff] %vm1377_vm3, %v1339_v9  ;;  %v3788_v38 = vpop.f32.mrb[2].mxu1 }
 0x1ac   : > { %v1354_v8 = vadd.f32 %v3788_v38, %v1225_v34  ;;  %v1348_v35 = vpop.f32.mrb[3].mxu1  ;;  %v860_v34 = vpop.permute.xlu1 %859 }
 0x1ad   : > { %v1349_v41 = vadd.f32 %v1348_v35, %v1220_v32  ;;  %v875_v9 = vpop.permute.xlu0 %874 }
 0x1ae   : > { %1381 = vst.msk [vmem:[#allocation3 + $0x18] sm:$0xff] %vm1377_vm3, %v1354_v8 }
 0x1af   : > { %1380 = vst.msk [vmem:[#allocation3 + $0x10] sm:$0xff] %vm1377_vm3, %v1349_v41  ;;  %v3791_v44 = vpop.f32.mrb[4].mxu1 }
 0x1b0   : > { %v1364_v48 = vadd.f32 %v3791_v44, %v1235_v40  ;;  %v1358_v49 = vpop.f32.mrb[5].mxu1  ;;  %v870_v8 = vpop.permute.xlu1 %869  ;;  %v1823_v44 = vld [vmem:[%s5163_s15 + $0x30] sm:$0xff] }
 0x1b1   : > { %v1359_v50 = vadd.f32 %v1358_v49, %v1230_v2  ;;  %v4762_v30 = vld [vmem:[#allocation3 + $0x8] sm:$0xff]  ;;  %v1821_v2 = vld [vmem:[%s5163_s15 + $0x20] sm:$0xff]  ;;  %v3873_v47 = vpack.c.bf16 %v1831_v20, %v1823_v44 }
 0x1b2   : > { %1383 = vst.msk [vmem:[#allocation3 + $0x28] sm:$0xff] %vm1377_vm3, %v1364_v48  ;;  %v4746_v17 = vld [vmem:[#allocation3] sm:$0xff]  ;;  %v3869_v45 = vpack.c.bf16 %v1829_v43, %v1821_v2  ;;  %v2812_v49 = vld [vmem:[%s5165_s17 + $0x8] sm:$0xff] }
 0x1b3   : > { %1382 = vst.msk [vmem:[#allocation3 + $0x20] sm:$0xff] %vm1377_vm3, %v1359_v50  ;;  %v3794_v53 = vpop.f32.mrb[6].mxu1  ;;  %3610 = vmatmul.mubr.msk.f32.vlgmr.msra.gmra.mrb[10].mxu1 %vm1377_vm3, %v4746_v17  ;;  %3618 = vmatmul.mubr.msk.f32.vlgmr.msra.gmra.mrb[14].mxu0 %vm1377_vm3, %v4746_v17  ;;  %v2814_v50 = vld [vmem:[%s5165_s17 + $0x18] sm:$0xff] }
 0x1b4   : > { %v1374_v56 = vadd.f32 %v3794_v53, %v1245_v24  ;;  %v1368_v58 = vpop.f32.mrb[7].mxu1  ;;  %1944 = vmatprep.mubr.f32.mxu1 %v4101_v3  ;;  %2057 = vmatprep.mubr.f32.mxu0 %v4101_v3 }
 0x1b5   : > { %v1369_v29 = vadd.f32 %v1368_v58, %v1240_v54  ;;  %2101 = vmatpush1.msra.mxu1 %v1845_v51  ;;  %2214 = vmatpush1.msra.mxu0 %v1847_v52  ;;  %v4779_v62 = vld [vmem:[#allocation3 + $0x18] sm:$0xff]  ;;  %v2811_v54 = vld [vmem:[%s5165_s17] sm:$0xff]  ;;  %v2816_v58 = vld [vmem:[%s5165_s17 + $0x28] sm:$0xff] }
 0x1b6   : > { %1385 = vst.msk [vmem:[#allocation3 + $0x38] sm:$0xff] %vm1377_vm3, %v1374_v56  ;;  %3860 = vmatprep.subr.bf16.mxu1 %v3859_v33  ;;  %3864 = vmatprep.subr.bf16.mxu0 %v3863_v26  ;;  %v4771_v59 = vld [vmem:[#allocation3 + $0x10] sm:$0xff] }
 0x1b7   : > { %1384 = vst.msk [vmem:[#allocation3 + $0x30] sm:$0xff] %vm1377_vm3, %v1369_v29  ;;  %3611 = vmatmul.mubr.msk.f32.gmra.mrb[12].mxu1 %vm1377_vm3, %v4762_v30  ;;  %3619 = vmatmul.mubr.msk.f32.gmra.mrb[16].mxu0 %vm1377_vm3, %v4762_v30  ;;  %v2813_v56 = vld [vmem:[%s5165_s17 + $0x10] sm:$0xff]  ;;  %v2818_v29 = vld [vmem:[%s5165_s17 + $0x38] sm:$0xff] }
 0x1b8   : > { %1950 = vmatprep.mubr.f32.mxu1 %v4101_v3  ;;  %2063 = vmatprep.mubr.f32.mxu0 %v4101_v3 }
 0x1b9   : > { %v4795_v55 = vld [vmem:[#allocation3 + $0x28] sm:$0xff] }
 0x1ba   : > { %v4787_v11 = vld [vmem:[#allocation3 + $0x20] sm:$0xff] }
 0x1bb   : > { %3612 = vmatmul.mubr.msk.f32.gmra.mrb[14].mxu1 %vm1377_vm3, %v4771_v59  ;;  %3620 = vmatmul.mubr.msk.f32.gmra.mrb[18].mxu0 %vm1377_vm3, %v4771_v59 }
 0x1bc   : > { %1956 = vmatprep.mubr.f32.mxu1 %v4101_v3  ;;  %2069 = vmatprep.mubr.f32.mxu0 %v4101_v3 }
 0x1bd   : > { %v4820_v61 = vld [vmem:[#allocation3 + $0x38] sm:$0xff] }
 0x1be   : > { %v4803_v14 = vld [vmem:[#allocation3 + $0x30] sm:$0xff] }
 0x1bf   : > { %3613 = vmatmul.mubr.msk.f32.gmra.mrb[16].mxu1 %vm1377_vm3, %v4779_v62  ;;  %3621 = vmatmul.mubr.msk.f32.gmra.mrb[20].mxu0 %vm1377_vm3, %v4779_v62 }
 0x1c0   : > { %1962 = vmatprep.mubr.f32.mxu1 %v4101_v3  ;;  %2075 = vmatprep.mubr.f32.mxu0 %v4101_v3 }
 0x1c3   : > { %3614 = vmatmul.mubr.msk.f32.gmra.mrb[18].mxu1 %vm1377_vm3, %v4787_v11  ;;  %3622 = vmatmul.mubr.msk.f32.gmra.mrb[22].mxu0 %vm1377_vm3, %v4787_v11 }
 0x1c4   : > { %1968 = vmatprep.mubr.f32.mxu1 %v4101_v3  ;;  %2081 = vmatprep.mubr.f32.mxu0 %v4101_v3 }
 0x1c7   : > { %3615 = vmatmul.mubr.msk.f32.gmra.mrb[20].mxu1 %vm1377_vm3, %v4795_v55  ;;  %3623 = vmatmul.mubr.msk.f32.gmra.mrb[24].mxu0 %vm1377_vm3, %v4795_v55 }
 0x1c8   : > { %1974 = vmatprep.mubr.f32.mxu1 %v4101_v3  ;;  %2087 = vmatprep.mubr.f32.mxu0 %v4101_v3 }
 0x1cb   : > { %3616 = vmatmul.mubr.msk.f32.gmra.mrb[22].mxu1 %vm1377_vm3, %v4803_v14  ;;  %3624 = vmatmul.mubr.msk.f32.gmra.mrb[26].mxu0 %vm1377_vm3, %v4803_v14 }
 0x1cc   : > { %1980 = vmatprep.mubr.f32.mxu1 %v4101_v3  ;;  %2093 = vmatprep.mubr.f32.mxu0 %v4101_v3 }
 0x1cf   : > { %3617 = vmatmul.mubr.msk.f32.gmra.mrb[24].mxu1 %vm1377_vm3, %v4820_v61  ;;  %3625 = vmatmul.mubr.msk.f32.gmra.mrb[28].mxu0 %vm1377_vm3, %v4820_v61 }
 0x1d0   : > { %2164 = vmatprep.mubr.f32.mxu1 %v4101_v3  ;;  %2277 = vmatprep.mubr.f32.mxu0 %v4101_v3 }
 0x1d3   : > { %3626 = vmatmul.mubr.msk.f32.vlgmr.msra.gmra.mrb[26].mxu1 %vm1377_vm3, %v4746_v17  ;;  %3634 = vmatmul.mubr.msk.f32.vlgmr.msra.gmra.mrb[30].mxu0 %vm1377_vm3, %v4746_v17 }
 0x1d4   : > { %2170 = vmatprep.mubr.f32.mxu1 %v4101_v3  ;;  %2283 = vmatprep.mubr.f32.mxu0 %v4101_v3 }
 0x1d5   : > { %v3761_v4 = vpop.f32.mrb[0].mxu0  ;;  %3862 = vmatpush1.bf16.msra.mxu1 %v3861_v46  ;;  %3866 = vmatpush1.bf16.msra.mxu0 %v3865_v42 }
 0x1d6   : > { %v974_v1 = vadd.f32 %v3761_v4, %v845_v7  ;;  %v968_v25 = vpop.f32.mrb[1].mxu0  ;;  %3868 = vmatprep.subr.bf16.mxu1 %v3867_v0  ;;  %3872 = vmatprep.subr.bf16.mxu0 %v3871_v21 }
 0x1d7   : > { %v969_v63 = vadd.f32 %v968_v25, %v840_v19  ;;  %3627 = vmatmul.mubr.msk.f32.gmra.mrb[28].mxu1 %vm1377_vm3, %v4762_v30  ;;  %3635 = vmatmul.mubr.msk.f32.gmra.mrb[32].mxu0 %vm1377_vm3, %v4762_v30  ;;  %v1639_v30 = vpop.permute.xlu0 %1638  ;;  %v2817_v25 = vld [vmem:[%s5165_s17 + $0x30] sm:$0xff] }
 0x1d8   : > { %1009 = vst.msk [vmem:[#allocation2 + $0x8] sm:$0xff] %vm1007_vm4, %v974_v1  ;;  %2176 = vmatprep.mubr.f32.mxu1 %v4101_v3  ;;  %2289 = vmatprep.mubr.f32.mxu0 %v4101_v3  ;;  %v2815_v1 = vld [vmem:[%s5165_s17 + $0x20] sm:$0xff] }
 0x1d9   : > { %1008 = vst.msk [vmem:[#allocation2] sm:$0xff] %vm1007_vm4, %v969_v63  ;;  %v3764_v6 = vpop.f32.mrb[2].mxu0 }
 0x1da   : > { %v984_v31 = vadd.f32 %v3764_v6, %v855_v22  ;;  %v978_v28 = vpop.f32.mrb[3].mxu0 }
 0x1db   : > { %v979_v27 = vadd.f32 %v978_v28, %v850_v23  ;;  %3628 = vmatmul.mubr.msk.f32.gmra.mrb[30].mxu1 %vm1377_vm3, %v4771_v59  ;;  %3636 = vmatmul.mubr.msk.f32.gmra.mrb[34].mxu0 %vm1377_vm3, %v4771_v59  ;;  %v1634_v59 = vpop.permute.xlu1 %1633 }
 0x1dc   : > { %1011 = vst.msk [vmem:[#allocation2 + $0x18] sm:$0xff] %vm1007_vm4, %v984_v31  ;;  %2182 = vmatprep.mubr.f32.mxu1 %v4101_v3  ;;  %2295 = vmatprep.mubr.f32.mxu0 %v4101_v3 }
 0x1dd   : > { %1010 = vst.msk [vmem:[#allocation2 + $0x10] sm:$0xff] %vm1007_vm4, %v979_v27  ;;  %v3767_v5 = vpop.f32.mrb[4].mxu0 }
 0x1de   : > { %v994_v32 = vadd.f32 %v3767_v5, %v865_v39  ;;  %v988_v36 = vpop.f32.mrb[5].mxu0 }
 0x1df   : > { %v989_v37 = vadd.f32 %v988_v36, %v860_v34  ;;  %3629 = vmatmul.mubr.msk.f32.gmra.mrb[32].mxu1 %vm1377_vm3, %v4779_v62  ;;  %3637 = vmatmul.mubr.msk.f32.gmra.mrb[36].mxu0 %vm1377_vm3, %v4779_v62  ;;  %v1810_v17 = vld [vmem:[#allocation2 + $0x8] sm:$0xff]  ;;  %v1649_v62 = vpop.permute.xlu0 %1648 }
 0x1e0   : > { %1013 = vst.msk [vmem:[#allocation2 + $0x28] sm:$0xff] %vm1007_vm4, %v994_v32  ;;  %2188 = vmatprep.mubr.f32.mxu1 %v4101_v3  ;;  %2301 = vmatprep.mubr.f32.mxu0 %v4101_v3  ;;  %v1809_v48 = vld [vmem:[#allocation2] sm:$0xff] }
 0x1e1   : > { %1012 = vst.msk [vmem:[#allocation2 + $0x20] sm:$0xff] %vm1007_vm4, %v989_v37  ;;  %v3770_v38 = vpop.f32.mrb[6].mxu0 }
 0x1e2   : > { %v1004_v35 = vadd.f32 %v3770_v38, %v875_v9  ;;  %v998_v40 = vpop.f32.mrb[7].mxu0 }
 0x1e3   : > { %v999_v41 = vadd.f32 %v998_v40, %v870_v8  ;;  %3630 = vmatmul.mubr.msk.f32.gmra.mrb[34].mxu1 %vm1377_vm3, %v4787_v11  ;;  %3638 = vmatmul.mubr.msk.f32.gmra.mrb[38].mxu0 %vm1377_vm3, %v4787_v11  ;;  %v1812_v52 = vld [vmem:[#allocation2 + $0x18] sm:$0xff]  ;;  %v1644_v11 = vpop.permute.xlu1 %1643 }
 0x1e4   : > { %1015 = vst.msk [vmem:[#allocation2 + $0x38] sm:$0xff] %vm1007_vm4, %v1004_v35  ;;  %2194 = vmatprep.mubr.f32.mxu1 %v4101_v3  ;;  %2307 = vmatprep.mubr.f32.mxu0 %v4101_v3  ;;  %v1811_v51 = vld [vmem:[#allocation2 + $0x10] sm:$0xff] }
 0x1e5   : > { %1014 = vst.msk [vmem:[#allocation2 + $0x30] sm:$0xff] %vm1007_vm4, %v999_v41 }
 0x1e7   : > { %3631 = vmatmul.mubr.msk.f32.gmra.mrb[36].mxu1 %vm1377_vm3, %v4795_v55  ;;  %3639 = vmatmul.mubr.msk.f32.gmra.mrb[40].mxu0 %vm1377_vm3, %v4795_v55  ;;  %v1814_v26 = vld [vmem:[#allocation2 + $0x28] sm:$0xff]  ;;  %v1659_v55 = vpop.permute.xlu0 %1658 }
 0x1e8   : > { %2200 = vmatprep.mubr.f32.mxu1 %v4101_v3  ;;  %2313 = vmatprep.mubr.f32.mxu0 %v4101_v3  ;;  %v1813_v33 = vld [vmem:[#allocation2 + $0x20] sm:$0xff] }
 0x1eb   : > { %3632 = vmatmul.mubr.msk.f32.gmra.mrb[38].mxu1 %vm1377_vm3, %v4803_v14  ;;  %3640 = vmatmul.mubr.msk.f32.gmra.mrb[42].mxu0 %vm1377_vm3, %v4803_v14  ;;  %v1816_v53 = vld [vmem:[#allocation2 + $0x38] sm:$0xff]  ;;  %v1654_v14 = vpop.permute.xlu1 %1653  ;;  %v1669_v60 = vpop.permute.xlu0 %1668 }
 0x1ec   : > { %2206 = vmatprep.mubr.f32.mxu1 %v4101_v3  ;;  %2319 = vmatprep.mubr.f32.mxu0 %v4101_v3  ;;  %v1815_v24 = vld [vmem:[#allocation2 + $0x30] sm:$0xff] }
 0x1ef   : > { %3633 = vmatmul.mubr.msk.f32.gmra.mrb[40].mxu1 %vm1377_vm3, %v4820_v61  ;;  %3641 = vmatmul.mubr.msk.f32.gmra.mrb[44].mxu0 %vm1377_vm3, %v4820_v61  ;;  %v1664_v15 = vpop.permute.xlu1 %1663 }
 0x1f0   : > { %2415 = vmatprep.mubr.f32.mxu1 %v4101_v3  ;;  %2528 = vmatprep.mubr.f32.mxu0 %v4101_v3 }
 0x1f3   : > { %3642 = vmatmul.mubr.msk.f32.vlgmr.msra.gmra.mrb[10].mxu1 %vm1007_vm4, %v1809_v48  ;;  %3650 = vmatmul.mubr.msk.f32.vlgmr.msra.gmra.mrb[14].mxu0 %vm1007_vm4, %v1809_v48 }
 0x1f4   : > { %2421 = vmatprep.mubr.f32.mxu1 %v4101_v3  ;;  %2534 = vmatprep.mubr.f32.mxu0 %v4101_v3 }
 0x1f5   : > { %3870 = vmatpush1.bf16.msra.mxu1 %v3869_v45  ;;  %3874 = vmatpush1.bf16.msra.mxu0 %v3873_v47 }
 0x1f6   : > { %2843 = vmatprep.subr.mxu1 %v2812_v49  ;;  %2956 = vmatprep.subr.mxu0 %v2814_v50 }
 0x1f7   : > { %3643 = vmatmul.mubr.msk.f32.gmra.mrb[12].mxu1 %vm1007_vm4, %v1810_v17  ;;  %3651 = vmatmul.mubr.msk.f32.gmra.mrb[16].mxu0 %vm1007_vm4, %v1810_v17 }
 0x1f8   : > { %2427 = vmatprep.mubr.f32.mxu1 %v4101_v3  ;;  %2540 = vmatprep.mubr.f32.mxu0 %v4101_v3 }
 0x1fb   : > { %3644 = vmatmul.mubr.msk.f32.gmra.mrb[14].mxu1 %vm1007_vm4, %v1811_v51  ;;  %3652 = vmatmul.mubr.msk.f32.gmra.mrb[18].mxu0 %vm1007_vm4, %v1811_v51 }
 0x1fc   : > { %2433 = vmatprep.mubr.f32.mxu1 %v4101_v3  ;;  %2546 = vmatprep.mubr.f32.mxu0 %v4101_v3 }
 0x1ff   : > { %3645 = vmatmul.mubr.msk.f32.gmra.mrb[16].mxu1 %vm1007_vm4, %v1812_v52  ;;  %3653 = vmatmul.mubr.msk.f32.gmra.mrb[20].mxu0 %vm1007_vm4, %v1812_v52 }
 0x200   : > { %2439 = vmatprep.mubr.f32.mxu1 %v4101_v3  ;;  %2552 = vmatprep.mubr.f32.mxu0 %v4101_v3 }
 0x203   : > { %3646 = vmatmul.mubr.msk.f32.gmra.mrb[18].mxu1 %vm1007_vm4, %v1813_v33  ;;  %3654 = vmatmul.mubr.msk.f32.gmra.mrb[22].mxu0 %vm1007_vm4, %v1813_v33 }
 0x204   : > { %2445 = vmatprep.mubr.f32.mxu1 %v4101_v3  ;;  %2558 = vmatprep.mubr.f32.mxu0 %v4101_v3 }
 0x207   : > { %3647 = vmatmul.mubr.msk.f32.gmra.mrb[20].mxu1 %vm1007_vm4, %v1814_v26  ;;  %3655 = vmatmul.mubr.msk.f32.gmra.mrb[24].mxu0 %vm1007_vm4, %v1814_v26 }
 0x208   : > { %2451 = vmatprep.mubr.f32.mxu1 %v4101_v3  ;;  %2564 = vmatprep.mubr.f32.mxu0 %v4101_v3 }
 0x20b   : > { %3648 = vmatmul.mubr.msk.f32.gmra.mrb[22].mxu1 %vm1007_vm4, %v1815_v24  ;;  %3656 = vmatmul.mubr.msk.f32.gmra.mrb[26].mxu0 %vm1007_vm4, %v1815_v24 }
 0x20c   : > { %2457 = vmatprep.mubr.f32.mxu1 %v4101_v3  ;;  %2570 = vmatprep.mubr.f32.mxu0 %v4101_v3 }
 0x20f   : > { %3649 = vmatmul.mubr.msk.f32.gmra.mrb[24].mxu1 %vm1007_vm4, %v1816_v53  ;;  %3657 = vmatmul.mubr.msk.f32.gmra.mrb[28].mxu0 %vm1007_vm4, %v1816_v53 }
 0x210   : > { %2641 = vmatprep.mubr.f32.mxu1 %v4101_v3  ;;  %2754 = vmatprep.mubr.f32.mxu0 %v4101_v3 }
 0x213   : > { %3658 = vmatmul.mubr.msk.f32.vlgmr.msra.gmra.mrb[26].mxu1 %vm1007_vm4, %v1809_v48  ;;  %3666 = vmatmul.mubr.msk.f32.vlgmr.msra.gmra.mrb[30].mxu0 %vm1007_vm4, %v1809_v48 }
 0x214   : > { %2647 = vmatprep.mubr.f32.mxu1 %v4101_v3  ;;  %2760 = vmatprep.mubr.f32.mxu0 %v4101_v3 }
 0x215   : > { %2844 = vmatpush1.msra.mxu1 %v2811_v54  ;;  %2957 = vmatpush1.msra.mxu0 %v2813_v56 }
 0x216   : > { %3069 = vmatprep.subr.mxu1 %v2816_v58  ;;  %3182 = vmatprep.subr.mxu0 %v2818_v29 }
 0x217   : > { %3659 = vmatmul.mubr.msk.f32.gmra.mrb[28].mxu1 %vm1007_vm4, %v1810_v17  ;;  %3667 = vmatmul.mubr.msk.f32.gmra.mrb[32].mxu0 %vm1007_vm4, %v1810_v17 }
 0x218   : > { %2653 = vmatprep.mubr.f32.mxu1 %v4101_v3  ;;  %2766 = vmatprep.mubr.f32.mxu0 %v4101_v3 }
 0x21b   : > { %3660 = vmatmul.mubr.msk.f32.gmra.mrb[30].mxu1 %vm1007_vm4, %v1811_v51  ;;  %3668 = vmatmul.mubr.msk.f32.gmra.mrb[34].mxu0 %vm1007_vm4, %v1811_v51 }
 0x21c   : > { %2659 = vmatprep.mubr.f32.mxu1 %v4101_v3  ;;  %2772 = vmatprep.mubr.f32.mxu0 %v4101_v3 }
 0x21f   : > { %3661 = vmatmul.mubr.msk.f32.gmra.mrb[32].mxu1 %vm1007_vm4, %v1812_v52  ;;  %3669 = vmatmul.mubr.msk.f32.gmra.mrb[36].mxu0 %vm1007_vm4, %v1812_v52 }
 0x220   : > { %2665 = vmatprep.mubr.f32.mxu1 %v4101_v3  ;;  %2778 = vmatprep.mubr.f32.mxu0 %v4101_v3 }
 0x223   : > { %3662 = vmatmul.mubr.msk.f32.gmra.mrb[34].mxu1 %vm1007_vm4, %v1813_v33  ;;  %3670 = vmatmul.mubr.msk.f32.gmra.mrb[38].mxu0 %vm1007_vm4, %v1813_v33 }
 0x224   : > { %2671 = vmatprep.mubr.f32.mxu1 %v4101_v3  ;;  %2784 = vmatprep.mubr.f32.mxu0 %v4101_v3 }
 0x227   : > { %3663 = vmatmul.mubr.msk.f32.gmra.mrb[36].mxu1 %vm1007_vm4, %v1814_v26  ;;  %3671 = vmatmul.mubr.msk.f32.gmra.mrb[40].mxu0 %vm1007_vm4, %v1814_v26 }
 0x228   : > { %2677 = vmatprep.mubr.f32.mxu1 %v4101_v3  ;;  %2790 = vmatprep.mubr.f32.mxu0 %v4101_v3 }
 0x22b   : > { %3664 = vmatmul.mubr.msk.f32.gmra.mrb[38].mxu1 %vm1007_vm4, %v1815_v24  ;;  %3672 = vmatmul.mubr.msk.f32.gmra.mrb[42].mxu0 %vm1007_vm4, %v1815_v24 }
 0x22c   : > { %2683 = vmatprep.mubr.f32.mxu1 %v4101_v3  ;;  %2796 = vmatprep.mubr.f32.mxu0 %v4101_v3 }
 0x22f   : > { %3665 = vmatmul.mubr.msk.f32.gmra.mrb[40].mxu1 %vm1007_vm4, %v1816_v53  ;;  %3673 = vmatmul.mubr.msk.f32.gmra.mrb[44].mxu0 %vm1007_vm4, %v1816_v53 }
 0x230   : > { %2907 = vmatprep.mubr.f32.mxu1 %v4101_v3  ;;  %3020 = vmatprep.mubr.f32.mxu0 %v4101_v3 }
 0x231   : > { %v3813_v10 = vpop.f32.mrb[8].mxu0  ;;  %v3822_v61 = vpop.f32.mrb[8].mxu1 }
 0x232   : > { %v1768_v16 = vadd.f32 %v3813_v10, %v1639_v30  ;;  %v1798_v13 = vadd.f32 %v3822_v61, %v1669_v60  ;;  %v1762_v7 = vpop.f32.mrb[9].mxu0  ;;  %v1792_v12 = vpop.f32.mrb[9].mxu1 }
 0x233   : > { %v1763_v18 = vadd.f32 %v1762_v7, %v1634_v59  ;;  %v1793_v57 = vadd.f32 %v1792_v12, %v1664_v15 }
 0x234   : > { %1802 = vst.msk [vmem:[#allocation4 + $0x8] sm:$0xff] %vm1377_vm3, %v1768_v16  ;;  %1808 = vst.msk [vmem:[#allocation4 + $0x38] sm:$0xff] %vm1377_vm3, %v1798_v13 }
 0x235   : > { %1801 = vst.msk [vmem:[#allocation4] sm:$0xff] %vm1377_vm3, %v1763_v18  ;;  %1807 = vst.msk [vmem:[#allocation4 + $0x30] sm:$0xff] %vm1377_vm3, %v1793_v57  ;;  %v3816_v19 = vpop.f32.mrb[10].mxu0 }
 0x236   : > { %v1778_v46 = vadd.f32 %v3816_v19, %v1649_v62  ;;  %v1772_v42 = vpop.f32.mrb[11].mxu0 }
 0x237   : > { %v1773_v0 = vadd.f32 %v1772_v42, %v1644_v11 }
 0x238   : > { %1804 = vst.msk [vmem:[#allocation4 + $0x18] sm:$0xff] %vm1377_vm3, %v1778_v46 }
 0x239   : > { %1803 = vst.msk [vmem:[#allocation4 + $0x10] sm:$0xff] %vm1377_vm3, %v1773_v0  ;;  %v3819_v21 = vpop.f32.mrb[12].mxu0 }
 0x23a   : > { %v1788_v22 = vadd.f32 %v3819_v21, %v1659_v55  ;;  %v1782_v4 = vpop.f32.mrb[13].mxu0 }
 0x23b   : > { %v1783_v23 = vadd.f32 %v1782_v4, %v1654_v14  ;;  %v2804_v6 = vld [vmem:[#allocation4 + $0x8] sm:$0xff]  ;;  %v2810_v5 = vld [vmem:[#allocation4 + $0x38] sm:$0xff] }
 0x23c   : > { %1806 = vst.msk [vmem:[#allocation4 + $0x28] sm:$0xff] %vm1377_vm3, %v1788_v22  ;;  %v2803_v63 = vld [vmem:[#allocation4] sm:$0xff]  ;;  %v2809_v34 = vld [vmem:[#allocation4 + $0x30] sm:$0xff] }
 0x23d   : > { %1805 = vst.msk [vmem:[#allocation4 + $0x20] sm:$0xff] %vm1377_vm3, %v1783_v23  ;;  %3674 = vmatmul.mubr.msk.f32.vlgmr.msra.gmra.mrb[10].mxu1 %vm1377_vm3, %v2803_v63  ;;  %3682 = vmatmul.mubr.msk.f32.vlgmr.msra.gmra.mrb[14].mxu0 %vm1377_vm3, %v2803_v63 }
 0x23e   : > { %3070 = vmatpush1.msra.mxu1 %v2815_v1  ;;  %3183 = vmatpush1.msra.mxu0 %v2817_v25 }
 0x23f   : > { %2913 = vmatprep.mubr.f32.mxu1 %v4101_v3  ;;  %3026 = vmatprep.mubr.f32.mxu0 %v4101_v3  ;;  %v2806_v28 = vld [vmem:[#allocation4 + $0x18] sm:$0xff] }
 0x240   : > { %v2805_v31 = vld [vmem:[#allocation4 + $0x10] sm:$0xff] }
 0x241   : > { %3675 = vmatmul.mubr.msk.f32.gmra.mrb[12].mxu1 %vm1377_vm3, %v2804_v6  ;;  %3683 = vmatmul.mubr.msk.f32.gmra.mrb[16].mxu0 %vm1377_vm3, %v2804_v6 }
 0x242   : > { %2919 = vmatprep.mubr.f32.mxu1 %v4101_v3  ;;  %3032 = vmatprep.mubr.f32.mxu0 %v4101_v3 }
 0x243   : > { %v2808_v27 = vld [vmem:[#allocation4 + $0x28] sm:$0xff] }
 0x244   : > { %v2807_v39 = vld [vmem:[#allocation4 + $0x20] sm:$0xff] }
 0x245   : > { %3676 = vmatmul.mubr.msk.f32.gmra.mrb[14].mxu1 %vm1377_vm3, %v2805_v31  ;;  %3684 = vmatmul.mubr.msk.f32.gmra.mrb[18].mxu0 %vm1377_vm3, %v2805_v31 }
 0x246   : > { %2925 = vmatprep.mubr.f32.mxu1 %v4101_v3  ;;  %3038 = vmatprep.mubr.f32.mxu0 %v4101_v3 }
 0x249   : > { %3677 = vmatmul.mubr.msk.f32.gmra.mrb[16].mxu1 %vm1377_vm3, %v2806_v28  ;;  %3685 = vmatmul.mubr.msk.f32.gmra.mrb[20].mxu0 %vm1377_vm3, %v2806_v28 }
 0x24a   : > { %2931 = vmatprep.mubr.f32.mxu1 %v4101_v3  ;;  %3044 = vmatprep.mubr.f32.mxu0 %v4101_v3 }
 0x24d   : > { %3678 = vmatmul.mubr.msk.f32.gmra.mrb[18].mxu1 %vm1377_vm3, %v2807_v39  ;;  %3686 = vmatmul.mubr.msk.f32.gmra.mrb[22].mxu0 %vm1377_vm3, %v2807_v39 }
 0x24e   : > { %2937 = vmatprep.mubr.f32.mxu1 %v4101_v3  ;;  %3050 = vmatprep.mubr.f32.mxu0 %v4101_v3 }
 0x251   : > { %3679 = vmatmul.mubr.msk.f32.gmra.mrb[20].mxu1 %vm1377_vm3, %v2808_v27  ;;  %3687 = vmatmul.mubr.msk.f32.gmra.mrb[24].mxu0 %vm1377_vm3, %v2808_v27 }
 0x252   : > { %2943 = vmatprep.mubr.f32.mxu1 %v4101_v3  ;;  %3056 = vmatprep.mubr.f32.mxu0 %v4101_v3 }
 0x255   : > { %3680 = vmatmul.mubr.msk.f32.gmra.mrb[22].mxu1 %vm1377_vm3, %v2809_v34  ;;  %3688 = vmatmul.mubr.msk.f32.gmra.mrb[26].mxu0 %vm1377_vm3, %v2809_v34 }
 0x256   : > { %2949 = vmatprep.mubr.f32.mxu1 %v4101_v3  ;;  %3062 = vmatprep.mubr.f32.mxu0 %v4101_v3 }
 0x259   : > { %3681 = vmatmul.mubr.msk.f32.gmra.mrb[24].mxu1 %vm1377_vm3, %v2810_v5  ;;  %3689 = vmatmul.mubr.msk.f32.gmra.mrb[28].mxu0 %vm1377_vm3, %v2810_v5 }
 0x25a   : > { %3133 = vmatprep.mubr.f32.mxu1 %v4101_v3  ;;  %3246 = vmatprep.mubr.f32.mxu0 %v4101_v3 }
 0x25d   : > { %3690 = vmatmul.mubr.msk.f32.vlgmr.msra.gmra.mrb[26].mxu1 %vm1377_vm3, %v2803_v63  ;;  %3698 = vmatmul.mubr.msk.f32.vlgmr.msra.gmra.mrb[30].mxu0 %vm1377_vm3, %v2803_v63 }
 0x25e   : > { %3139 = vmatprep.mubr.f32.mxu1 %v4101_v3  ;;  %3252 = vmatprep.mubr.f32.mxu0 %v4101_v3 }
 0x261   : > { %3691 = vmatmul.mubr.msk.f32.gmra.mrb[28].mxu1 %vm1377_vm3, %v2804_v6  ;;  %3699 = vmatmul.mubr.msk.f32.gmra.mrb[32].mxu0 %vm1377_vm3, %v2804_v6 }
 0x262   : > { %3145 = vmatprep.mubr.f32.mxu1 %v4101_v3  ;;  %3258 = vmatprep.mubr.f32.mxu0 %v4101_v3 }
 0x265   : > { %3692 = vmatmul.mubr.msk.f32.gmra.mrb[30].mxu1 %vm1377_vm3, %v2805_v31  ;;  %3700 = vmatmul.mubr.msk.f32.gmra.mrb[34].mxu0 %vm1377_vm3, %v2805_v31 }
 0x266   : > { %3151 = vmatprep.mubr.f32.mxu1 %v4101_v3  ;;  %3264 = vmatprep.mubr.f32.mxu0 %v4101_v3 }
 0x269   : > { %3693 = vmatmul.mubr.msk.f32.gmra.mrb[32].mxu1 %vm1377_vm3, %v2806_v28  ;;  %3701 = vmatmul.mubr.msk.f32.gmra.mrb[36].mxu0 %vm1377_vm3, %v2806_v28 }
 0x26a   : > { %3157 = vmatprep.mubr.f32.mxu1 %v4101_v3  ;;  %3270 = vmatprep.mubr.f32.mxu0 %v4101_v3 }
 0x26d   : > { %3694 = vmatmul.mubr.msk.f32.gmra.mrb[34].mxu1 %vm1377_vm3, %v2807_v39  ;;  %3702 = vmatmul.mubr.msk.f32.gmra.mrb[38].mxu0 %vm1377_vm3, %v2807_v39 }
 0x26e   : > { %3163 = vmatprep.mubr.f32.mxu1 %v4101_v3  ;;  %3276 = vmatprep.mubr.f32.mxu0 %v4101_v3 }
 0x271   : > { %3695 = vmatmul.mubr.msk.f32.gmra.mrb[36].mxu1 %vm1377_vm3, %v2808_v27  ;;  %3703 = vmatmul.mubr.msk.f32.gmra.mrb[40].mxu0 %vm1377_vm3, %v2808_v27 }
 0x272   : > { %3169 = vmatprep.mubr.f32.mxu1 %v4101_v3  ;;  %3282 = vmatprep.mubr.f32.mxu0 %v4101_v3 }
 0x275   : > { %3696 = vmatmul.mubr.msk.f32.gmra.mrb[38].mxu1 %vm1377_vm3, %v2809_v34  ;;  %3704 = vmatmul.mubr.msk.f32.gmra.mrb[42].mxu0 %vm1377_vm3, %v2809_v34 }
 0x276   : > { %3175 = vmatprep.mubr.f32.mxu1 %v4101_v3  ;;  %3288 = vmatprep.mubr.f32.mxu0 %v4101_v3 }
 0x279   : > { %3697 = vmatmul.mubr.msk.f32.gmra.mrb[40].mxu1 %vm1377_vm3, %v2810_v5  ;;  %3705 = vmatmul.mubr.msk.f32.gmra.mrb[44].mxu0 %vm1377_vm3, %v2810_v5 }
 0x310   : > { %v2909_v32 = vpop.f32.mrb[10].mxu1  ;;  %v3022_v3 = vpop.f32.mrb[14].mxu0 }
 0x311   : > { %3359 = vst [vmem:[%s5073_s20] sm:$0xff] %v2909_v32  ;;  %3361 = vst [vmem:[%s5073_s20 + $0x10] sm:$0xff] %v3022_v3  ;;  %v2911_v36 = vpop.f32.mrb[11].mxu1  ;;  %v3024_v37 = vpop.f32.mrb[15].mxu0 }
 0x312   : > { %3360 = vst [vmem:[%s5073_s20 + $0x8] sm:$0xff] %v2911_v36  ;;  %3362 = vst [vmem:[%s5073_s20 + $0x18] sm:$0xff] %v3024_v37 }
 0x314   : > { %v2915_v9 = vpop.f32.mrb[12].mxu1  ;;  %v3028_v38 = vpop.f32.mrb[16].mxu0 }
 0x315   : > { %3367 = vst [vmem:[%s5073_s20 + $0x40] sm:$0xff] %v2915_v9  ;;  %3369 = vst [vmem:[%s5073_s20 + $0x50] sm:$0xff] %v3028_v38  ;;  %v2917_v8 = vpop.f32.mrb[13].mxu1  ;;  %v3030_v35 = vpop.f32.mrb[17].mxu0 }
 0x316   : > { %3368 = vst [vmem:[%s5073_s20 + $0x48] sm:$0xff] %v2917_v8  ;;  %3370 = vst [vmem:[%s5073_s20 + $0x58] sm:$0xff] %v3030_v35 }
 0x318   : > { %v2921_v40 = vpop.f32.mrb[14].mxu1  ;;  %v3034_v41 = vpop.f32.mrb[18].mxu0 }
 0x319   : > { %3375 = vst [vmem:[%s5073_s20 + $0x80] sm:$0xff] %v2921_v40  ;;  %3377 = vst [vmem:[%s5073_s20 + $0x90] sm:$0xff] %v3034_v41  ;;  %v2923_v2 = vpop.f32.mrb[15].mxu1  ;;  %v3036_v43 = vpop.f32.mrb[19].mxu0 }
 0x31a   : > { %3376 = vst [vmem:[%s5073_s20 + $0x88] sm:$0xff] %v2923_v2  ;;  %3378 = vst [vmem:[%s5073_s20 + $0x98] sm:$0xff] %v3036_v43 }
 0x31c   : > { %v2927_v44 = vpop.f32.mrb[16].mxu1  ;;  %v3040_v20 = vpop.f32.mrb[20].mxu0 }
 0x31d   : > { %3383 = vst [vmem:[%s5073_s20 + $0xc0] sm:$0xff] %v2927_v44  ;;  %3385 = vst [vmem:[%s5073_s20 + $0xd0] sm:$0xff] %v3040_v20  ;;  %v2929_v45 = vpop.f32.mrb[17].mxu1  ;;  %v3042_v47 = vpop.f32.mrb[21].mxu0 }
 0x31e   : > { %3384 = vst [vmem:[%s5073_s20 + $0xc8] sm:$0xff] %v2929_v45  ;;  %3386 = vst [vmem:[%s5073_s20 + $0xd8] sm:$0xff] %v3042_v47 }
 0x320   : > { %v2933_v48 = vpop.f32.mrb[18].mxu1  ;;  %v3046_v49 = vpop.f32.mrb[22].mxu0 }
 0x321   : > { %3391 = vst [vmem:[%s5073_s20 + $0x100] sm:$0xff] %v2933_v48  ;;  %3393 = vst [vmem:[%s5073_s20 + $0x110] sm:$0xff] %v3046_v49  ;;  %v2935_v50 = vpop.f32.mrb[19].mxu1  ;;  %v3048_v17 = vpop.f32.mrb[23].mxu0 }
 0x322   : > { %3392 = vst [vmem:[%s5073_s20 + $0x108] sm:$0xff] %v2935_v50  ;;  %3394 = vst [vmem:[%s5073_s20 + $0x118] sm:$0xff] %v3048_v17 }
 0x324   : > { %v2939_v51 = vpop.f32.mrb[20].mxu1  ;;  %v3052_v52 = vpop.f32.mrb[24].mxu0 }
 0x325   : > { %3399 = vst [vmem:[%s5073_s20 + $0x140] sm:$0xff] %v2939_v51  ;;  %3401 = vst [vmem:[%s5073_s20 + $0x150] sm:$0xff] %v3052_v52  ;;  %v2941_v33 = vpop.f32.mrb[21].mxu1  ;;  %v3054_v26 = vpop.f32.mrb[25].mxu0 }
 0x326   : > { %3400 = vst [vmem:[%s5073_s20 + $0x148] sm:$0xff] %v2941_v33  ;;  %3402 = vst [vmem:[%s5073_s20 + $0x158] sm:$0xff] %v3054_v26 }
 0x328   : > { %v2945_v24 = vpop.f32.mrb[22].mxu1  ;;  %v3058_v53 = vpop.f32.mrb[26].mxu0 }
 0x329   : > { %3407 = vst [vmem:[%s5073_s20 + $0x180] sm:$0xff] %v2945_v24  ;;  %3409 = vst [vmem:[%s5073_s20 + $0x190] sm:$0xff] %v3058_v53  ;;  %v2947_v54 = vpop.f32.mrb[23].mxu1  ;;  %v3060_v56 = vpop.f32.mrb[27].mxu0 }
 0x32a   : > { %3408 = vst [vmem:[%s5073_s20 + $0x188] sm:$0xff] %v2947_v54  ;;  %3410 = vst [vmem:[%s5073_s20 + $0x198] sm:$0xff] %v3060_v56 }
 0x32c   : > { %v2951_v58 = vpop.f32.mrb[24].mxu1  ;;  %v3064_v29 = vpop.f32.mrb[28].mxu0 }
 0x32d   : > { %3415 = vst [vmem:[%s5073_s20 + $0x1c0] sm:$0xff] %v2951_v58  ;;  %3417 = vst [vmem:[%s5073_s20 + $0x1d0] sm:$0xff] %v3064_v29  ;;  %v2953_v30 = vpop.f32.mrb[25].mxu1  ;;  %v3066_v59 = vpop.f32.mrb[29].mxu0 }
 0x32e   : > { %3416 = vst [vmem:[%s5073_s20 + $0x1c8] sm:$0xff] %v2953_v30  ;;  %3418 = vst [vmem:[%s5073_s20 + $0x1d8] sm:$0xff] %v3066_v59 }
 0x330   : > { %v3135_v62 = vpop.f32.mrb[26].mxu1  ;;  %v3248_v11 = vpop.f32.mrb[30].mxu0 }
 0x331   : > { %3363 = vst [vmem:[%s5073_s20 + $0x20] sm:$0xff] %v3135_v62  ;;  %3365 = vst [vmem:[%s5073_s20 + $0x30] sm:$0xff] %v3248_v11  ;;  %v3137_v55 = vpop.f32.mrb[27].mxu1  ;;  %v3250_v14 = vpop.f32.mrb[31].mxu0 }
 0x332   : > { %3364 = vst [vmem:[%s5073_s20 + $0x28] sm:$0xff] %v3137_v55  ;;  %3366 = vst [vmem:[%s5073_s20 + $0x38] sm:$0xff] %v3250_v14 }
 0x334   : > { %v3141_v60 = vpop.f32.mrb[28].mxu1  ;;  %v3254_v15 = vpop.f32.mrb[32].mxu0 }
 0x335   : > { %3371 = vst [vmem:[%s5073_s20 + $0x60] sm:$0xff] %v3141_v60  ;;  %3373 = vst [vmem:[%s5073_s20 + $0x70] sm:$0xff] %v3254_v15  ;;  %v3143_v10 = vpop.f32.mrb[29].mxu1  ;;  %v3256_v61 = vpop.f32.mrb[33].mxu0 }
 0x336   : > { %3372 = vst [vmem:[%s5073_s20 + $0x68] sm:$0xff] %v3143_v10  ;;  %3374 = vst [vmem:[%s5073_s20 + $0x78] sm:$0xff] %v3256_v61 }
 0x338   : > { %v3147_v16 = vpop.f32.mrb[30].mxu1  ;;  %v3260_v13 = vpop.f32.mrb[34].mxu0 }
 0x339   : > { %3379 = vst [vmem:[%s5073_s20 + $0xa0] sm:$0xff] %v3147_v16  ;;  %3381 = vst [vmem:[%s5073_s20 + $0xb0] sm:$0xff] %v3260_v13  ;;  %v3149_v7 = vpop.f32.mrb[31].mxu1  ;;  %v3262_v12 = vpop.f32.mrb[35].mxu0 }
 0x33a   : > { %3380 = vst [vmem:[%s5073_s20 + $0xa8] sm:$0xff] %v3149_v7  ;;  %3382 = vst [vmem:[%s5073_s20 + $0xb8] sm:$0xff] %v3262_v12 }
 0x33c   : > { %v3153_v18 = vpop.f32.mrb[32].mxu1  ;;  %v3266_v57 = vpop.f32.mrb[36].mxu0 }
 0x33d   : > { %3387 = vst [vmem:[%s5073_s20 + $0xe0] sm:$0xff] %v3153_v18  ;;  %3389 = vst [vmem:[%s5073_s20 + $0xf0] sm:$0xff] %v3266_v57  ;;  %v3155_v19 = vpop.f32.mrb[33].mxu1  ;;  %v3268_v46 = vpop.f32.mrb[37].mxu0 }
 0x33e   : > { %3388 = vst [vmem:[%s5073_s20 + $0xe8] sm:$0xff] %v3155_v19  ;;  %3390 = vst [vmem:[%s5073_s20 + $0xf8] sm:$0xff] %v3268_v46 }
 0x340   : > { %v3159_v42 = vpop.f32.mrb[34].mxu1  ;;  %v3272_v0 = vpop.f32.mrb[38].mxu0 }
 0x341   : > { %3395 = vst [vmem:[%s5073_s20 + $0x120] sm:$0xff] %v3159_v42  ;;  %3397 = vst [vmem:[%s5073_s20 + $0x130] sm:$0xff] %v3272_v0  ;;  %v3161_v21 = vpop.f32.mrb[35].mxu1  ;;  %v3274_v22 = vpop.f32.mrb[39].mxu0 }
 0x342   : > { %3396 = vst [vmem:[%s5073_s20 + $0x128] sm:$0xff] %v3161_v21  ;;  %3398 = vst [vmem:[%s5073_s20 + $0x138] sm:$0xff] %v3274_v22 }
 0x344   : > { %v3165_v4 = vpop.f32.mrb[36].mxu1  ;;  %v3278_v23 = vpop.f32.mrb[40].mxu0 }
 0x345   : > { %3403 = vst [vmem:[%s5073_s20 + $0x160] sm:$0xff] %v3165_v4  ;;  %3405 = vst [vmem:[%s5073_s20 + $0x170] sm:$0xff] %v3278_v23  ;;  %v3167_v1 = vpop.f32.mrb[37].mxu1  ;;  %v3280_v25 = vpop.f32.mrb[41].mxu0 }
 0x346   : > { %3404 = vst [vmem:[%s5073_s20 + $0x168] sm:$0xff] %v3167_v1  ;;  %3406 = vst [vmem:[%s5073_s20 + $0x178] sm:$0xff] %v3280_v25 }
 0x348   : > { %v3171_v63 = vpop.f32.mrb[38].mxu1  ;;  %v3284_v6 = vpop.f32.mrb[42].mxu0 }
 0x349   : > { %3411 = vst [vmem:[%s5073_s20 + $0x1a0] sm:$0xff] %v3171_v63  ;;  %3413 = vst [vmem:[%s5073_s20 + $0x1b0] sm:$0xff] %v3284_v6  ;;  %v3173_v31 = vpop.f32.mrb[39].mxu1  ;;  %v3286_v28 = vpop.f32.mrb[43].mxu0 }
 0x34a   : > { %3412 = vst [vmem:[%s5073_s20 + $0x1a8] sm:$0xff] %v3173_v31  ;;  %3414 = vst [vmem:[%s5073_s20 + $0x1b8] sm:$0xff] %v3286_v28 }
 0x34c   : > { %v3177_v39 = vpop.f32.mrb[40].mxu1  ;;  %v3290_v27 = vpop.f32.mrb[44].mxu0 }
 0x34d   : > { %3419 = vst [vmem:[%s5073_s20 + $0x1e0] sm:$0xff] %v3177_v39  ;;  %3421 = vst [vmem:[%s5073_s20 + $0x1f0] sm:$0xff] %v3290_v27  ;;  %v3179_v34 = vpop.f32.mrb[41].mxu1  ;;  %v3292_v5 = vpop.f32.mrb[45].mxu0 }
 0x34e   : > { %3420 = vst [vmem:[%s5073_s20 + $0x1e8] sm:$0xff] %v3179_v34  ;;  %3422 = vst [vmem:[%s5073_s20 + $0x1f8] sm:$0xff] %v3292_v5 }
 0x34f PF: > { %s28_s29 = sadd.s32 1, %s4096_s29   ;;  %s5173_s27 = smov %s4092_s28 }
 0x350   : > { %p25_p5 = scmp.ge.s32.totalorder %s28_s29, 4   ;;  %s5174_s28 = smov %s5176_s30 }
 0x352   :  { %27 = sbr.rel (!%p25_p5) target bundleno = 4 (0x4), region = 141 }

</bundles_post_ra>
